<compile_context>
chip_gen: v6e
topology: v6e:2x2x1
jax: 0.10.0
libtpu: 0.0.40
codegen_flags: <defaults>
</compile_context>

<pallas_src>
import jax
import jax.numpy as jnp
from jax.experimental import pallas as pl
from jax.experimental.pallas import tpu as pltpu

# ------------------------------ config (small, deterministic) ------------------
HIDDEN = 32        # hidden_channels
OUT_DIM = 8        # out_dim (num classes)
NUM_LAYERS = 2     # cfg.MODEL.NUM_LAYERS
# cfg.GRAPH.FUSION_LAYERS = [-1]  ->  fusion at layer index 1 (hard-wired below)
DA, DV = 32, 48             # raw audio / video node feature dims
NA, NV, G = 16, 16, 2       # audio nodes, video nodes, graphs in batch
EPS = 1e-5

# ---- packed (1, HIDDEN) parameter-vector rows (inside the params slab) --------
(VEC_B_A0, VEC_B_V0, VEC_G_A0, VEC_BE_A0, VEC_G_V0, VEC_BE_V0,
 VEC_B_SH, VEC_GAT_B, VEC_A_SRC, VEC_A_DST,
 VEC_G_A1, VEC_BE_A1, VEC_ATT, VEC_LIN_B, VEC_ROWS) = range(15)
VEC_PAD_ROWS = 16           # pad the vector table to a sublane multiple

# ---- data slab layout: width 128 lanes, 8-row-aligned sublane bands -----------
ROW_AAA = 0      # a_aa    (NA, NA)
ROW_AVV = 16     # a_vv    (NV, NV)
ROW_AVA = 32     # a_va    (NA, NV)
ROW_MTA = 48     # memb_a^T (NA, G)
ROW_MTV = 64     # memb_v^T (NV, G)
ROW_MA = 80      # memb_a  (G, NA)
ROW_MV = 88      # memb_v  (G, NV)
ROW_OH = 96      # onehot  (G, OUT_DIM)
ROW_XA = 104     # x_audio (NA, DA)
ROW_XV = 120     # x_video (NV, DV)
DATA_ROWS, DATA_LANES = 136, 128

# ---- params slab layout: width 64 lanes, 8-row-aligned sublane bands ----------
PROW_WA0 = 0     # w_a0              (DA, HIDDEN)
PROW_WV0 = 32    # w_v0              (DV, HIDDEN)
PROW_WSD = 80    # [w_sh | w_dst]    (HIDDEN, 2*HIDDEN)   lane-packed
PROW_WSRC = 112  # w_src             (HIDDEN, HIDDEN)
PROW_LINW = 144  # lin_w             (HIDDEN, OUT_DIM)
PROW_VEC = 176   # vector table      (VEC_PAD_ROWS, HIDDEN)
PARAM_ROWS, PARAM_LANES = 192, 64

# ---- output slab layout (single lane-dense (8,128) writeback) -----------------
OUT_ROWS, OUT_LANES = 8, 128          # rows 0..G-1: [pred | loss | acc | 0...]


# ------------------------------ fused forward kernel ---------------------------
def _hetero_gnn_fused_kernel(data_ref, params_ref, out_ref):
  f32 = jnp.float32

  # ---------------- unpack data slab (static, aligned slices -> one DMA) -------
  a_aa = data_ref[ROW_AAA:ROW_AAA + NA, 0:NA]
  a_vv = data_ref[ROW_AVV:ROW_AVV + NV, 0:NV]
  a_va = data_ref[ROW_AVA:ROW_AVA + NA, 0:NV]
  membT_a = data_ref[ROW_MTA:ROW_MTA + NA, 0:G]
  membT_v = data_ref[ROW_MTV:ROW_MTV + NV, 0:G]
  memb_a = data_ref[ROW_MA:ROW_MA + G, 0:NA]
  memb_v = data_ref[ROW_MV:ROW_MV + G, 0:NV]
  onehot = data_ref[ROW_OH:ROW_OH + G, 0:OUT_DIM]
  x_a_in = data_ref[ROW_XA:ROW_XA + NA, 0:DA]
  x_v_in = data_ref[ROW_XV:ROW_XV + NV, 0:DV]

  # ---------------- unpack params slab (one DMA) --------------------------------
  w_a0 = params_ref[PROW_WA0:PROW_WA0 + DA, 0:HIDDEN]
  w_v0 = params_ref[PROW_WV0:PROW_WV0 + DV, 0:HIDDEN]
  w_sh_dst = params_ref[PROW_WSD:PROW_WSD + HIDDEN, 0:2 * HIDDEN]
  w_src = params_ref[PROW_WSRC:PROW_WSRC + HIDDEN, 0:HIDDEN]
  lin_w = params_ref[PROW_LINW:PROW_LINW + HIDDEN, 0:OUT_DIM]
  vecs = params_ref[PROW_VEC:PROW_VEC + VEC_PAD_ROWS, 0:HIDDEN]

  def vec(i):                         # (1, HIDDEN) parameter row
    return vecs[i:i + 1, :]

  # per-graph 1/(count*H): exact divide (only (G,1) scalars; review note) --------
  hdim = f32(HIDDEN)
  cnt_a = jnp.maximum(jnp.sum(memb_a, axis=1, keepdims=True), 1.0)
  cnt_v = jnp.maximum(jnp.sum(memb_v, axis=1, keepdims=True), 1.0)
  inv_norm_a = 1.0 / (cnt_a * hdim)
  inv_norm_v = 1.0 / (cnt_v * hdim)

  def relu_graph_layernorm(h, memb, membT, inv_norm, gamma, beta):
    # relu -> dropout(skipped, see TODO) -> torch_geometric LayerNorm(mode='graph')
    # Two dependent MXU matmuls total (was four): memb @ [sum|sumsq], membT @ [mean|var].
    x = jnp.maximum(h, 0.0)                                           # (N,H)
    s_node = jnp.sum(x, axis=1, keepdims=True)                        # (N,1)
    q_node = jnp.sum(x * x, axis=1, keepdims=True)                    # (N,1)
    sq = jnp.concatenate([s_node, q_node], axis=1)                    # (N,2)
    stats_g = jnp.dot(memb, sq, preferred_element_type=f32)           # (G,2)
    mean_g = stats_g[:, 0:1] * inv_norm
    ex2_g = stats_g[:, 1:2] * inv_norm
    var_g = jnp.maximum(ex2_g - mean_g * mean_g, 0.0)                 # guard cancellation
    mv_g = jnp.concatenate([mean_g, var_g], axis=1)                   # (G,2)
    mv_n = jnp.dot(membT, mv_g, preferred_element_type=f32)           # (N,2)
    mean_n = mv_n[:, 0:1]
    var_n = mv_n[:, 1:2]
    return (x - mean_n) * jax.lax.rsqrt(var_n + EPS) * gamma + beta

  def masked_softmax_matmul(scores, mask, values):
    # row-wise softmax of `scores` restricted to mask>0 (rows with no support
    # produce all-zero weights), followed by the weighted sum of `values`.
    neg = f32(-1e30)
    masked = jnp.where(mask > 0.0, scores, neg)
    m = jnp.max(masked, axis=1, keepdims=True)
    p = jnp.exp(masked - m) * mask
    denom = jnp.sum(p, axis=1, keepdims=True)
    alpha = p * pl.reciprocal(jnp.maximum(denom, f32(1e-30)), approx=True)
    return jnp.dot(alpha, values, preferred_element_type=f32)

  # ---------------- layer 0: modality-specific GCNConv --------------------------
  # GCNConv(-1, H, normalize=False, add_self_loops=False):  A @ (X @ W) + b
  h_a = jnp.dot(a_aa, jnp.dot(x_a_in, w_a0, preferred_element_type=f32),
                preferred_element_type=f32) + vec(VEC_B_A0)
  h_v = jnp.dot(a_vv, jnp.dot(x_v_in, w_v0, preferred_element_type=f32),
                preferred_element_type=f32) + vec(VEC_B_V0)
  x_a = relu_graph_layernorm(h_a, memb_a, membT_a, inv_norm_a,
                             vec(VEC_G_A0), vec(VEC_BE_A0))
  x_v = relu_graph_layernorm(h_v, memb_v, membT_v, inv_norm_v,
                             vec(VEC_G_V0), vec(VEC_BE_V0))

  # ---------------- layer 1: fusion (shared GCN + GAT video->audio, aggr='sum') -
  # Lane-packed projection: one (NA,H) @ (H,2H) matmul gives both x_a@W_shared
  # and x_a@W_dst.  The layer-1 video branch (shared GCN on x_v + its LayerNorm)
  # feeds nothing downstream in the reference forward and is deleted (review).
  proj_a = jnp.dot(x_a, w_sh_dst, preferred_element_type=f32)         # (NA, 2H)
  h_a = jnp.dot(a_aa, proj_a[:, 0:HIDDEN],
                preferred_element_type=f32) + vec(VEC_B_SH)           # shared GCN (audio)
  h_dst = proj_a[:, HIDDEN:2 * HIDDEN]                                # (NA,H) GAT dst proj

  # bipartite GATConv((-1,-1), H, heads=1, concat=False), LeakyReLU(0.2) attention
  h_src = jnp.dot(x_v, w_src, preferred_element_type=f32)             # (NV,H)
  # e_dst: VPU multiply + cross-lane reduce (no N=1 MXU matmul)
  e_dst = jnp.sum(h_dst * vec(VEC_A_DST), axis=1, keepdims=True)      # (NA,1)
  # e_src must land on the lane axis -> tiny trans_b contraction (1,H)x(NV,H)->(1,NV)
  e_src = jax.lax.dot_general(vec(VEC_A_SRC), h_src, (((1,), (1,)), ((), ())),
                              preferred_element_type=f32)             # (1,NV)
  logits = e_dst + e_src                                              # (NA,NV)
  logits = jnp.where(logits >= 0.0, logits, 0.2 * logits)             # LeakyReLU(0.2)
  h_a = h_a + masked_softmax_matmul(logits, a_va, h_src) + vec(VEC_GAT_B)

  x_a = relu_graph_layernorm(h_a, memb_a, membT_a, inv_norm_a,
                             vec(VEC_G_A1), vec(VEC_BE_A1))

  # ---------------- GlobalAttention readout over audio nodes --------------------
  gate = jax.lax.dot_general(vec(VEC_ATT), x_a, (((1,), (1,)), ((), ())),
                             preferred_element_type=f32)              # (1,NA)
  graph_embed = masked_softmax_matmul(gate, memb_a, x_a)              # (G,H)

  # ---------------- Linear head + CrossEntropyLoss + accuracy -------------------
  pred = jnp.dot(graph_embed, lin_w,
                 preferred_element_type=f32) + vec(VEC_LIN_B)[:, 0:OUT_DIM]   # (G,C)
  pm = jnp.max(pred, axis=1, keepdims=True)                                   # (G,1)
  lse = pm + jnp.log(jnp.sum(jnp.exp(pred - pm), axis=1, keepdims=True))      # (G,1)
  label_score = jnp.sum(onehot * pred, axis=1, keepdims=True)                 # (G,1)
  nll = lse - label_score                                                     # (G,1)
  loss = jnp.sum(nll, axis=0, keepdims=True) * f32(1.0 / G)                   # (1,1)
  correct = (label_score >= pm).astype(f32)                                   # (G,1)
  acc = jnp.sum(correct, axis=0, keepdims=True) * f32(1.0 / G)                # (1,1)

  # single lane-dense output slab: rows 0..G-1 = [pred | loss | acc | 0...]
  zeros_g1 = jnp.zeros((G, 1), f32)
  payload = jnp.concatenate([pred, zeros_g1 + loss, zeros_g1 + acc], axis=1)  # (G,C+2)
  out_ref[...] = jnp.zeros((OUT_ROWS, OUT_LANES), f32)
  out_ref[0:G, 0:OUT_DIM + 2] = payload


# ------------------------------ wrapper ----------------------------------------
@jax.jit
def hetero_gnn_forward(params_slab, data_slab):
  vmem = pl.BlockSpec(memory_space=pltpu.MemorySpace.VMEM)
  out = pl.pallas_call(
      _hetero_gnn_fused_kernel,
      out_shape=jax.ShapeDtypeStruct((OUT_ROWS, OUT_LANES), jnp.float32),
      in_specs=[vmem, vmem],
      out_specs=vmem,
  )(data_slab, params_slab)
  pred = out[0:G, 0:OUT_DIM]
  loss = out[0, OUT_DIM]
  acc = out[0, OUT_DIM + 1]
  return pred, loss, acc


# ------------------------------ packing helpers ---------------------------------
def _place(slab, row, arr):
  r, c = arr.shape
  return slab.at[row:row + r, 0:c].set(arr)


def _glorot(key, shape):
  fan_in, fan_out = shape[0], shape[1]
  lim = (6.0 / (fan_in + fan_out)) ** 0.5
  return jax.random.uniform(key, shape, jnp.float32, -lim, lim)


def init_params(key):
  ks = jax.random.split(key, 9)
  ones = jnp.ones((1, HIDDEN), jnp.float32)
  zeros = jnp.zeros((1, HIDDEN), jnp.float32)

  rows = [None] * VEC_ROWS
  rows[VEC_B_A0] = zeros                            # layer0 audio GCN bias
  rows[VEC_B_V0] = zeros                            # layer0 video GCN bias
  rows[VEC_G_A0], rows[VEC_BE_A0] = ones, zeros     # layer0 audio LayerNorm
  rows[VEC_G_V0], rows[VEC_BE_V0] = ones, zeros     # layer0 video LayerNorm
  rows[VEC_B_SH] = zeros                            # layer1 shared GCN bias
  rows[VEC_GAT_B] = zeros                           # GAT bias
  rows[VEC_A_SRC] = _glorot(ks[3], (1, HIDDEN))     # GAT a_src
  rows[VEC_A_DST] = _glorot(ks[4], (1, HIDDEN))     # GAT a_dst (stored as a row)
  rows[VEC_G_A1], rows[VEC_BE_A1] = ones, zeros     # layer1 audio LayerNorm
  rows[VEC_ATT] = _glorot(ks[5], (1, HIDDEN))       # GlobalAttention gate weight
  rows[VEC_LIN_B] = zeros                           # linear-head bias (lanes 0..OUT_DIM-1)
  rows += [zeros] * (VEC_PAD_ROWS - VEC_ROWS)
  vec_table = jnp.concatenate(rows, axis=0)         # (16, HIDDEN)

  w_sh = _glorot(ks[2], (HIDDEN, HIDDEN))
  w_dst = _glorot(ks[7], (HIDDEN, HIDDEN))

  slab = jnp.zeros((PARAM_ROWS, PARAM_LANES), jnp.float32)
  slab = _place(slab, PROW_WA0, _glorot(ks[0], (DA, HIDDEN)))
  slab = _place(slab, PROW_WV0, _glorot(ks[1], (DV, HIDDEN)))
  slab = _place(slab, PROW_WSD, jnp.concatenate([w_sh, w_dst], axis=1))   # lane-packed
  slab = _place(slab, PROW_WSRC, _glorot(ks[6], (HIDDEN, HIDDEN)))
  slab = _place(slab, PROW_LINW, _glorot(ks[8], (HIDDEN, OUT_DIM)))
  slab = _place(slab, PROW_VEC, vec_table)
  return slab


def pack_data(x_audio, x_video, a_aa, a_vv, a_va, memb_a, memb_v, onehot):
  # Built ONCE at data-build time (outside the jitted forward); both orientations
  # of the membership matrices are baked in so the forward does no transposes.
  slab = jnp.zeros((DATA_ROWS, DATA_LANES), jnp.float32)
  slab = _place(slab, ROW_AAA, a_aa)
  slab = _place(slab, ROW_AVV, a_vv)
  slab = _place(slab, ROW_AVA, a_va)
  slab = _place(slab, ROW_MTA, memb_a.T)
  slab = _place(slab, ROW_MTV, memb_v.T)
  slab = _place(slab, ROW_MA, memb_a)
  slab = _place(slab, ROW_MV, memb_v)
  slab = _place(slab, ROW_OH, onehot)
  slab = _place(slab, ROW_XA, x_audio)
  slab = _place(slab, ROW_XV, x_video)
  return slab


# ------------------------------ demo / driver -----------------------------------
if __name__ == "__main__":
  key = jax.random.PRNGKey(0)
  kp, kxa, kxv, kaa, kvv, kva, klab = jax.random.split(key, 7)

  params_slab = init_params(kp)

  # node features
  x_audio = jax.random.normal(kxa, (NA, DA), jnp.float32)
  x_video = jax.random.normal(kxv, (NV, DV), jnp.float32)

  # graph membership (G graphs, equal split) -> one-hot membership matrices
  batch_audio = jnp.repeat(jnp.arange(G), NA // G)
  batch_video = jnp.repeat(jnp.arange(G), NV // G)
  memb_a = jax.nn.one_hot(batch_audio, G, dtype=jnp.float32).T   # (G, NA)
  memb_v = jax.nn.one_hot(batch_video, G, dtype=jnp.float32).T   # (G, NV)

  # dense adjacency, within-graph random edges; A[dst, src] = 1.0
  same_aa = memb_a.T @ memb_a
  same_vv = memb_v.T @ memb_v
  cross_va = memb_a.T @ memb_v
  a_aa = ((jax.random.uniform(kaa, (NA, NA)) < 0.35) & (same_aa > 0)).astype(jnp.float32)
  a_vv = ((jax.random.uniform(kvv, (NV, NV)) < 0.35) & (same_vv > 0)).astype(jnp.float32)
  a_va = ((jax.random.uniform(kva, (NA, NV)) < 0.30) & (cross_va > 0)).astype(jnp.float32)

  labels = jax.random.randint(klab, (G,), 0, OUT_DIM)
  onehot = jax.nn.one_hot(labels, OUT_DIM, dtype=jnp.float32)

  data_slab = pack_data(x_audio, x_video, a_aa, a_vv, a_va, memb_a, memb_v, onehot)

  pred, loss, acc = hetero_gnn_forward(params_slab, data_slab)
  jax.block_until_ready((pred, loss, acc))

  assert pred.shape == (G, OUT_DIM)
  assert bool(jnp.isfinite(pred).all()) and bool(jnp.isfinite(loss)) and bool(jnp.isfinite(acc))
  assert 0.0 <= float(acc) <= 1.0
  print("KERNEL_OK")
</pallas_src>

<mosaic_0001>
module attributes {stable_mosaic.version = 11 : i64} {
  func.func @_hetero_gnn_fused_kernel(%arg0: memref<136x128xf32, #tpu.memory_space<vmem>>, %arg1: memref<192x64xf32, #tpu.memory_space<vmem>>, %arg2: memref<8x128xf32, #tpu.memory_space<vmem>>) attributes {dimension_semantics = [], scalar_prefetch = 0 : i64, scratch_operands = 0 : i64, tpu.core_type = #tpu.core_type<tc>} {
    %c0 = arith.constant 0 : index
    %c0_0 = arith.constant 0 : index
    %0 = vector.load %arg0[%c0, %c0_0] : memref<136x128xf32, #tpu.memory_space<vmem>>, vector<16x16xf32>
    %c16 = arith.constant 16 : index
    %c0_1 = arith.constant 0 : index
    %1 = vector.load %arg0[%c16, %c0_1] : memref<136x128xf32, #tpu.memory_space<vmem>>, vector<16x16xf32>
    %c32 = arith.constant 32 : index
    %c0_2 = arith.constant 0 : index
    %2 = vector.load %arg0[%c32, %c0_2] : memref<136x128xf32, #tpu.memory_space<vmem>>, vector<16x16xf32>
    %c48 = arith.constant 48 : index
    %c0_3 = arith.constant 0 : index
    %3 = vector.load %arg0[%c48, %c0_3] : memref<136x128xf32, #tpu.memory_space<vmem>>, vector<16x2xf32>
    %c64 = arith.constant 64 : index
    %c0_4 = arith.constant 0 : index
    %4 = vector.load %arg0[%c64, %c0_4] : memref<136x128xf32, #tpu.memory_space<vmem>>, vector<16x2xf32>
    %c80 = arith.constant 80 : index
    %c0_5 = arith.constant 0 : index
    %5 = vector.load %arg0[%c80, %c0_5] : memref<136x128xf32, #tpu.memory_space<vmem>>, vector<2x16xf32>
    %c88 = arith.constant 88 : index
    %c0_6 = arith.constant 0 : index
    %6 = vector.load %arg0[%c88, %c0_6] : memref<136x128xf32, #tpu.memory_space<vmem>>, vector<2x16xf32>
    %c96 = arith.constant 96 : index
    %c0_7 = arith.constant 0 : index
    %7 = vector.load %arg0[%c96, %c0_7] : memref<136x128xf32, #tpu.memory_space<vmem>>, vector<2x8xf32>
    %c104 = arith.constant 104 : index
    %c0_8 = arith.constant 0 : index
    %8 = vector.load %arg0[%c104, %c0_8] : memref<136x128xf32, #tpu.memory_space<vmem>>, vector<16x32xf32>
    %c120 = arith.constant 120 : index
    %c0_9 = arith.constant 0 : index
    %9 = vector.load %arg0[%c120, %c0_9] : memref<136x128xf32, #tpu.memory_space<vmem>>, vector<16x48xf32>
    %c0_10 = arith.constant 0 : index
    %c0_11 = arith.constant 0 : index
    %10 = vector.load %arg1[%c0_10, %c0_11] : memref<192x64xf32, #tpu.memory_space<vmem>>, vector<32x32xf32>
    %c32_12 = arith.constant 32 : index
    %c0_13 = arith.constant 0 : index
    %11 = vector.load %arg1[%c32_12, %c0_13] : memref<192x64xf32, #tpu.memory_space<vmem>>, vector<48x32xf32>
    %c80_14 = arith.constant 80 : index
    %c0_15 = arith.constant 0 : index
    %12 = vector.load %arg1[%c80_14, %c0_15] : memref<192x64xf32, #tpu.memory_space<vmem>>, vector<32x64xf32>
    %c112 = arith.constant 112 : index
    %c0_16 = arith.constant 0 : index
    %13 = vector.load %arg1[%c112, %c0_16] : memref<192x64xf32, #tpu.memory_space<vmem>>, vector<32x32xf32>
    %c144 = arith.constant 144 : index
    %c0_17 = arith.constant 0 : index
    %14 = vector.load %arg1[%c144, %c0_17] : memref<192x64xf32, #tpu.memory_space<vmem>>, vector<32x8xf32>
    %c176 = arith.constant 176 : index
    %c0_18 = arith.constant 0 : index
    %15 = vector.load %arg1[%c176, %c0_18] : memref<192x64xf32, #tpu.memory_space<vmem>>, vector<16x32xf32>
    %cst = arith.constant dense<0.000000e+00> : vector<2xf32>
    %16 = vector.multi_reduction <add>, %5, %cst [1] : vector<2x16xf32> to vector<2xf32>
    %17 = vector.shape_cast %16 : vector<2xf32> to vector<2x1xf32>
    %cst_19 = arith.constant 1.000000e+00 : f32
    %18 = vector.broadcast %cst_19 : f32 to vector<2x1xf32>
    %19 = arith.maximumf %17, %18 : vector<2x1xf32>
    %cst_20 = arith.constant dense<0.000000e+00> : vector<2xf32>
    %20 = vector.multi_reduction <add>, %6, %cst_20 [1] : vector<2x16xf32> to vector<2xf32>
    %21 = vector.shape_cast %20 : vector<2xf32> to vector<2x1xf32>
    %cst_21 = arith.constant 1.000000e+00 : f32
    %22 = vector.broadcast %cst_21 : f32 to vector<2x1xf32>
    %23 = arith.maximumf %21, %22 : vector<2x1xf32>
    %cst_22 = arith.constant 3.200000e+01 : f32
    %24 = vector.broadcast %cst_22 : f32 to vector<2x1xf32>
    %25 = arith.mulf %19, %24 : vector<2x1xf32>
    %cst_23 = arith.constant 1.000000e+00 : f32
    %26 = vector.broadcast %cst_23 : f32 to vector<2x1xf32>
    %27 = arith.divf %26, %25 : vector<2x1xf32>
    %cst_24 = arith.constant 3.200000e+01 : f32
    %28 = vector.broadcast %cst_24 : f32 to vector<2x1xf32>
    %29 = arith.mulf %23, %28 : vector<2x1xf32>
    %cst_25 = arith.constant 1.000000e+00 : f32
    %30 = vector.broadcast %cst_25 : f32 to vector<2x1xf32>
    %31 = arith.divf %30, %29 : vector<2x1xf32>
    %cst_26 = arith.constant dense<0.000000e+00> : vector<16x32xf32>
    %32 = tpu.matmul %8, %10, %cst_26 {dimension_numbers = #tpu.dot_dimension_numbers<[1], [0], [0], [1], [0, 0, 1, 1], [], []>} : vector<16x32xf32>, vector<32x32xf32>, vector<16x32xf32> -> vector<16x32xf32>
    %cst_27 = arith.constant dense<0.000000e+00> : vector<16x32xf32>
    %33 = tpu.matmul %0, %32, %cst_27 {dimension_numbers = #tpu.dot_dimension_numbers<[1], [0], [0], [1], [0, 0, 1, 1], [], []>} : vector<16x16xf32>, vector<16x32xf32>, vector<16x32xf32> -> vector<16x32xf32>
    %34 = vector.extract_strided_slice %15 {offsets = [0, 0], sizes = [1, 32], strides = [1, 1]} : vector<16x32xf32> to vector<1x32xf32>
    %35 = vector.broadcast %34 : vector<1x32xf32> to vector<16x32xf32>
    %36 = arith.addf %33, %35 : vector<16x32xf32>
    %cst_28 = arith.constant dense<0.000000e+00> : vector<16x32xf32>
    %37 = tpu.matmul %9, %11, %cst_28 {dimension_numbers = #tpu.dot_dimension_numbers<[1], [0], [0], [1], [0, 0, 1, 1], [], []>} : vector<16x48xf32>, vector<48x32xf32>, vector<16x32xf32> -> vector<16x32xf32>
    %cst_29 = arith.constant dense<0.000000e+00> : vector<16x32xf32>
    %38 = tpu.matmul %1, %37, %cst_29 {dimension_numbers = #tpu.dot_dimension_numbers<[1], [0], [0], [1], [0, 0, 1, 1], [], []>} : vector<16x16xf32>, vector<16x32xf32>, vector<16x32xf32> -> vector<16x32xf32>
    %39 = vector.extract_strided_slice %15 {offsets = [1, 0], sizes = [1, 32], strides = [1, 1]} : vector<16x32xf32> to vector<1x32xf32>
    %40 = vector.broadcast %39 : vector<1x32xf32> to vector<16x32xf32>
    %41 = arith.addf %38, %40 : vector<16x32xf32>
    %42 = vector.extract_strided_slice %15 {offsets = [2, 0], sizes = [1, 32], strides = [1, 1]} : vector<16x32xf32> to vector<1x32xf32>
    %43 = vector.extract_strided_slice %15 {offsets = [3, 0], sizes = [1, 32], strides = [1, 1]} : vector<16x32xf32> to vector<1x32xf32>
    %cst_30 = arith.constant 0.000000e+00 : f32
    %44 = vector.broadcast %cst_30 : f32 to vector<16x32xf32>
    %45 = arith.maximumf %36, %44 : vector<16x32xf32>
    %cst_31 = arith.constant dense<0.000000e+00> : vector<16xf32>
    %46 = vector.multi_reduction <add>, %45, %cst_31 [1] : vector<16x32xf32> to vector<16xf32>
    %47 = vector.shape_cast %46 : vector<16xf32> to vector<16x1xf32>
    %48 = arith.mulf %45, %45 : vector<16x32xf32>
    %cst_32 = arith.constant dense<0.000000e+00> : vector<16xf32>
    %49 = vector.multi_reduction <add>, %48, %cst_32 [1] : vector<16x32xf32> to vector<16xf32>
    %50 = vector.shape_cast %49 : vector<16xf32> to vector<16x1xf32>
    %51 = tpu.concatenate %47, %50 in 1 : vector<16x1xf32>, vector<16x1xf32> -> vector<16x2xf32>
    %cst_33 = arith.constant dense<0.000000e+00> : vector<2x2xf32>
    %52 = tpu.matmul %5, %51, %cst_33 {dimension_numbers = #tpu.dot_dimension_numbers<[1], [0], [0], [1], [0, 0, 1, 1], [], []>} : vector<2x16xf32>, vector<16x2xf32>, vector<2x2xf32> -> vector<2x2xf32>
    %53 = vector.extract_strided_slice %52 {offsets = [0, 0], sizes = [2, 1], strides = [1, 1]} : vector<2x2xf32> to vector<2x1xf32>
    %54 = arith.mulf %53, %27 : vector<2x1xf32>
    %55 = vector.extract_strided_slice %52 {offsets = [0, 1], sizes = [2, 1], strides = [1, 1]} : vector<2x2xf32> to vector<2x1xf32>
    %56 = arith.mulf %55, %27 : vector<2x1xf32>
    %57 = arith.mulf %54, %54 : vector<2x1xf32>
    %58 = arith.subf %56, %57 : vector<2x1xf32>
    %cst_34 = arith.constant 0.000000e+00 : f32
    %59 = vector.broadcast %cst_34 : f32 to vector<2x1xf32>
    %60 = arith.maximumf %58, %59 : vector<2x1xf32>
    %61 = tpu.concatenate %54, %60 in 1 : vector<2x1xf32>, vector<2x1xf32> -> vector<2x2xf32>
    %cst_35 = arith.constant dense<0.000000e+00> : vector<16x2xf32>
    %62 = tpu.matmul %3, %61, %cst_35 {dimension_numbers = #tpu.dot_dimension_numbers<[1], [0], [0], [1], [0, 0, 1, 1], [], []>} : vector<16x2xf32>, vector<2x2xf32>, vector<16x2xf32> -> vector<16x2xf32>
    %63 = vector.extract_strided_slice %62 {offsets = [0, 0], sizes = [16, 1], strides = [1, 1]} : vector<16x2xf32> to vector<16x1xf32>
    %64 = vector.extract_strided_slice %62 {offsets = [0, 1], sizes = [16, 1], strides = [1, 1]} : vector<16x2xf32> to vector<16x1xf32>
    %65 = vector.broadcast %63 : vector<16x1xf32> to vector<16x32xf32>
    %66 = arith.subf %45, %65 : vector<16x32xf32>
    %cst_36 = arith.constant 9.99999974E-6 : f32
    %67 = vector.broadcast %cst_36 : f32 to vector<16x1xf32>
    %68 = arith.addf %64, %67 : vector<16x1xf32>
    %69 = math.rsqrt %68 : vector<16x1xf32>
    %70 = vector.broadcast %69 : vector<16x1xf32> to vector<16x32xf32>
    %71 = arith.mulf %66, %70 : vector<16x32xf32>
    %72 = vector.broadcast %42 : vector<1x32xf32> to vector<16x32xf32>
    %73 = arith.mulf %71, %72 : vector<16x32xf32>
    %74 = vector.broadcast %43 : vector<1x32xf32> to vector<16x32xf32>
    %75 = arith.addf %73, %74 : vector<16x32xf32>
    %76 = vector.extract_strided_slice %15 {offsets = [4, 0], sizes = [1, 32], strides = [1, 1]} : vector<16x32xf32> to vector<1x32xf32>
    %77 = vector.extract_strided_slice %15 {offsets = [5, 0], sizes = [1, 32], strides = [1, 1]} : vector<16x32xf32> to vector<1x32xf32>
    %cst_37 = arith.constant 0.000000e+00 : f32
    %78 = vector.broadcast %cst_37 : f32 to vector<16x32xf32>
    %79 = arith.maximumf %41, %78 : vector<16x32xf32>
    %cst_38 = arith.constant dense<0.000000e+00> : vector<16xf32>
    %80 = vector.multi_reduction <add>, %79, %cst_38 [1] : vector<16x32xf32> to vector<16xf32>
    %81 = vector.shape_cast %80 : vector<16xf32> to vector<16x1xf32>
    %82 = arith.mulf %79, %79 : vector<16x32xf32>
    %cst_39 = arith.constant dense<0.000000e+00> : vector<16xf32>
    %83 = vector.multi_reduction <add>, %82, %cst_39 [1] : vector<16x32xf32> to vector<16xf32>
    %84 = vector.shape_cast %83 : vector<16xf32> to vector<16x1xf32>
    %85 = tpu.concatenate %81, %84 in 1 : vector<16x1xf32>, vector<16x1xf32> -> vector<16x2xf32>
    %cst_40 = arith.constant dense<0.000000e+00> : vector<2x2xf32>
    %86 = tpu.matmul %6, %85, %cst_40 {dimension_numbers = #tpu.dot_dimension_numbers<[1], [0], [0], [1], [0, 0, 1, 1], [], []>} : vector<2x16xf32>, vector<16x2xf32>, vector<2x2xf32> -> vector<2x2xf32>
    %87 = vector.extract_strided_slice %86 {offsets = [0, 0], sizes = [2, 1], strides = [1, 1]} : vector<2x2xf32> to vector<2x1xf32>
    %88 = arith.mulf %87, %31 : vector<2x1xf32>
    %89 = vector.extract_strided_slice %86 {offsets = [0, 1], sizes = [2, 1], strides = [1, 1]} : vector<2x2xf32> to vector<2x1xf32>
    %90 = arith.mulf %89, %31 : vector<2x1xf32>
    %91 = arith.mulf %88, %88 : vector<2x1xf32>
    %92 = arith.subf %90, %91 : vector<2x1xf32>
    %cst_41 = arith.constant 0.000000e+00 : f32
    %93 = vector.broadcast %cst_41 : f32 to vector<2x1xf32>
    %94 = arith.maximumf %92, %93 : vector<2x1xf32>
    %95 = tpu.concatenate %88, %94 in 1 : vector<2x1xf32>, vector<2x1xf32> -> vector<2x2xf32>
    %cst_42 = arith.constant dense<0.000000e+00> : vector<16x2xf32>
    %96 = tpu.matmul %4, %95, %cst_42 {dimension_numbers = #tpu.dot_dimension_numbers<[1], [0], [0], [1], [0, 0, 1, 1], [], []>} : vector<16x2xf32>, vector<2x2xf32>, vector<16x2xf32> -> vector<16x2xf32>
    %97 = vector.extract_strided_slice %96 {offsets = [0, 0], sizes = [16, 1], strides = [1, 1]} : vector<16x2xf32> to vector<16x1xf32>
    %98 = vector.extract_strided_slice %96 {offsets = [0, 1], sizes = [16, 1], strides = [1, 1]} : vector<16x2xf32> to vector<16x1xf32>
    %99 = vector.broadcast %97 : vector<16x1xf32> to vector<16x32xf32>
    %100 = arith.subf %79, %99 : vector<16x32xf32>
    %cst_43 = arith.constant 9.99999974E-6 : f32
    %101 = vector.broadcast %cst_43 : f32 to vector<16x1xf32>
    %102 = arith.addf %98, %101 : vector<16x1xf32>
    %103 = math.rsqrt %102 : vector<16x1xf32>
    %104 = vector.broadcast %103 : vector<16x1xf32> to vector<16x32xf32>
    %105 = arith.mulf %100, %104 : vector<16x32xf32>
    %106 = vector.broadcast %76 : vector<1x32xf32> to vector<16x32xf32>
    %107 = arith.mulf %105, %106 : vector<16x32xf32>
    %108 = vector.broadcast %77 : vector<1x32xf32> to vector<16x32xf32>
    %109 = arith.addf %107, %108 : vector<16x32xf32>
    %cst_44 = arith.constant dense<0.000000e+00> : vector<16x64xf32>
    %110 = tpu.matmul %75, %12, %cst_44 {dimension_numbers = #tpu.dot_dimension_numbers<[1], [0], [0], [1], [0, 0, 1, 1], [], []>} : vector<16x32xf32>, vector<32x64xf32>, vector<16x64xf32> -> vector<16x64xf32>
    %111 = vector.extract_strided_slice %110 {offsets = [0, 0], sizes = [16, 32], strides = [1, 1]} : vector<16x64xf32> to vector<16x32xf32>
    %cst_45 = arith.constant dense<0.000000e+00> : vector<16x32xf32>
    %112 = tpu.matmul %0, %111, %cst_45 {dimension_numbers = #tpu.dot_dimension_numbers<[1], [0], [0], [1], [0, 0, 1, 1], [], []>} : vector<16x16xf32>, vector<16x32xf32>, vector<16x32xf32> -> vector<16x32xf32>
    %113 = vector.extract_strided_slice %15 {offsets = [6, 0], sizes = [1, 32], strides = [1, 1]} : vector<16x32xf32> to vector<1x32xf32>
    %114 = vector.broadcast %113 : vector<1x32xf32> to vector<16x32xf32>
    %115 = arith.addf %112, %114 : vector<16x32xf32>
    %116 = vector.extract_strided_slice %110 {offsets = [0, 32], sizes = [16, 32], strides = [1, 1]} : vector<16x64xf32> to vector<16x32xf32>
    %cst_46 = arith.constant dense<0.000000e+00> : vector<16x32xf32>
    %117 = tpu.matmul %109, %13, %cst_46 {dimension_numbers = #tpu.dot_dimension_numbers<[1], [0], [0], [1], [0, 0, 1, 1], [], []>} : vector<16x32xf32>, vector<32x32xf32>, vector<16x32xf32> -> vector<16x32xf32>
    %118 = vector.extract_strided_slice %15 {offsets = [9, 0], sizes = [1, 32], strides = [1, 1]} : vector<16x32xf32> to vector<1x32xf32>
    %119 = vector.broadcast %118 : vector<1x32xf32> to vector<16x32xf32>
    %120 = arith.mulf %116, %119 : vector<16x32xf32>
    %cst_47 = arith.constant dense<0.000000e+00> : vector<16xf32>
    %121 = vector.multi_reduction <add>, %120, %cst_47 [1] : vector<16x32xf32> to vector<16xf32>
    %122 = vector.shape_cast %121 : vector<16xf32> to vector<16x1xf32>
    %123 = vector.extract_strided_slice %15 {offsets = [8, 0], sizes = [1, 32], strides = [1, 1]} : vector<16x32xf32> to vector<1x32xf32>
    %cst_48 = arith.constant dense<0.000000e+00> : vector<1x16xf32>
    %124 = tpu.matmul %123, %117, %cst_48 {dimension_numbers = #tpu.dot_dimension_numbers<[1], [1], [0], [0], [0, 0, 1, 0], [], []>} : vector<1x32xf32>, vector<16x32xf32>, vector<1x16xf32> -> vector<1x16xf32>
    %125 = vector.broadcast %122 : vector<16x1xf32> to vector<16x16xf32>
    %126 = vector.broadcast %124 : vector<1x16xf32> to vector<16x16xf32>
    %127 = arith.addf %125, %126 : vector<16x16xf32>
    %cst_49 = arith.constant 0.000000e+00 : f32
    %128 = vector.broadcast %cst_49 : f32 to vector<16x16xf32>
    %129 = arith.cmpf oge, %127, %128 : vector<16x16xf32>
    %cst_50 = arith.constant 2.000000e-01 : f32
    %130 = vector.broadcast %cst_50 : f32 to vector<16x16xf32>
    %131 = arith.mulf %130, %127 : vector<16x16xf32>
    %132 = arith.select %129, %127, %131 : vector<16x16xi1>, vector<16x16xf32>
    %cst_51 = arith.constant 0.000000e+00 : f32
    %133 = vector.broadcast %cst_51 : f32 to vector<16x16xf32>
    %134 = arith.cmpf ogt, %2, %133 : vector<16x16xf32>
    %cst_52 = arith.constant -1.000000e+30 : f32
    %135 = vector.broadcast %cst_52 : f32 to vector<16x16xf32>
    %136 = arith.select %134, %132, %135 : vector<16x16xi1>, vector<16x16xf32>
    %cst_53 = arith.constant dense<0xFF800000> : vector<16xf32>
    %137 = vector.multi_reduction <maximumf>, %136, %cst_53 [1] : vector<16x16xf32> to vector<16xf32>
    %138 = vector.shape_cast %137 : vector<16xf32> to vector<16x1xf32>
    %139 = vector.broadcast %138 : vector<16x1xf32> to vector<16x16xf32>
    %140 = arith.subf %136, %139 : vector<16x16xf32>
    %141 = math.exp %140 : vector<16x16xf32>
    %142 = arith.mulf %141, %2 : vector<16x16xf32>
    %cst_54 = arith.constant dense<0.000000e+00> : vector<16xf32>
    %143 = vector.multi_reduction <add>, %142, %cst_54 [1] : vector<16x16xf32> to vector<16xf32>
    %144 = vector.shape_cast %143 : vector<16xf32> to vector<16x1xf32>
    %cst_55 = arith.constant 1.000000e-30 : f32
    %145 = vector.broadcast %cst_55 : f32 to vector<16x1xf32>
    %146 = arith.maximumf %144, %145 : vector<16x1xf32>
    %147 = tpu.reciprocal %146 {approx = true} : vector<16x1xf32> -> vector<16x1xf32>
    %148 = vector.broadcast %147 : vector<16x1xf32> to vector<16x16xf32>
    %149 = arith.mulf %142, %148 : vector<16x16xf32>
    %cst_56 = arith.constant dense<0.000000e+00> : vector<16x32xf32>
    %150 = tpu.matmul %149, %117, %cst_56 {dimension_numbers = #tpu.dot_dimension_numbers<[1], [0], [0], [1], [0, 0, 1, 1], [], []>} : vector<16x16xf32>, vector<16x32xf32>, vector<16x32xf32> -> vector<16x32xf32>
    %151 = arith.addf %115, %150 : vector<16x32xf32>
    %152 = vector.extract_strided_slice %15 {offsets = [7, 0], sizes = [1, 32], strides = [1, 1]} : vector<16x32xf32> to vector<1x32xf32>
    %153 = vector.broadcast %152 : vector<1x32xf32> to vector<16x32xf32>
    %154 = arith.addf %151, %153 : vector<16x32xf32>
    %155 = vector.extract_strided_slice %15 {offsets = [10, 0], sizes = [1, 32], strides = [1, 1]} : vector<16x32xf32> to vector<1x32xf32>
    %156 = vector.extract_strided_slice %15 {offsets = [11, 0], sizes = [1, 32], strides = [1, 1]} : vector<16x32xf32> to vector<1x32xf32>
    %cst_57 = arith.constant 0.000000e+00 : f32
    %157 = vector.broadcast %cst_57 : f32 to vector<16x32xf32>
    %158 = arith.maximumf %154, %157 : vector<16x32xf32>
    %cst_58 = arith.constant dense<0.000000e+00> : vector<16xf32>
    %159 = vector.multi_reduction <add>, %158, %cst_58 [1] : vector<16x32xf32> to vector<16xf32>
    %160 = vector.shape_cast %159 : vector<16xf32> to vector<16x1xf32>
    %161 = arith.mulf %158, %158 : vector<16x32xf32>
    %cst_59 = arith.constant dense<0.000000e+00> : vector<16xf32>
    %162 = vector.multi_reduction <add>, %161, %cst_59 [1] : vector<16x32xf32> to vector<16xf32>
    %163 = vector.shape_cast %162 : vector<16xf32> to vector<16x1xf32>
    %164 = tpu.concatenate %160, %163 in 1 : vector<16x1xf32>, vector<16x1xf32> -> vector<16x2xf32>
    %cst_60 = arith.constant dense<0.000000e+00> : vector<2x2xf32>
    %165 = tpu.matmul %5, %164, %cst_60 {dimension_numbers = #tpu.dot_dimension_numbers<[1], [0], [0], [1], [0, 0, 1, 1], [], []>} : vector<2x16xf32>, vector<16x2xf32>, vector<2x2xf32> -> vector<2x2xf32>
    %166 = vector.extract_strided_slice %165 {offsets = [0, 0], sizes = [2, 1], strides = [1, 1]} : vector<2x2xf32> to vector<2x1xf32>
    %167 = arith.mulf %166, %27 : vector<2x1xf32>
    %168 = vector.extract_strided_slice %165 {offsets = [0, 1], sizes = [2, 1], strides = [1, 1]} : vector<2x2xf32> to vector<2x1xf32>
    %169 = arith.mulf %168, %27 : vector<2x1xf32>
    %170 = arith.mulf %167, %167 : vector<2x1xf32>
    %171 = arith.subf %169, %170 : vector<2x1xf32>
    %cst_61 = arith.constant 0.000000e+00 : f32
    %172 = vector.broadcast %cst_61 : f32 to vector<2x1xf32>
    %173 = arith.maximumf %171, %172 : vector<2x1xf32>
    %174 = tpu.concatenate %167, %173 in 1 : vector<2x1xf32>, vector<2x1xf32> -> vector<2x2xf32>
    %cst_62 = arith.constant dense<0.000000e+00> : vector<16x2xf32>
    %175 = tpu.matmul %3, %174, %cst_62 {dimension_numbers = #tpu.dot_dimension_numbers<[1], [0], [0], [1], [0, 0, 1, 1], [], []>} : vector<16x2xf32>, vector<2x2xf32>, vector<16x2xf32> -> vector<16x2xf32>
    %176 = vector.extract_strided_slice %175 {offsets = [0, 0], sizes = [16, 1], strides = [1, 1]} : vector<16x2xf32> to vector<16x1xf32>
    %177 = vector.extract_strided_slice %175 {offsets = [0, 1], sizes = [16, 1], strides = [1, 1]} : vector<16x2xf32> to vector<16x1xf32>
    %178 = vector.broadcast %176 : vector<16x1xf32> to vector<16x32xf32>
    %179 = arith.subf %158, %178 : vector<16x32xf32>
    %cst_63 = arith.constant 9.99999974E-6 : f32
    %180 = vector.broadcast %cst_63 : f32 to vector<16x1xf32>
    %181 = arith.addf %177, %180 : vector<16x1xf32>
    %182 = math.rsqrt %181 : vector<16x1xf32>
    %183 = vector.broadcast %182 : vector<16x1xf32> to vector<16x32xf32>
    %184 = arith.mulf %179, %183 : vector<16x32xf32>
    %185 = vector.broadcast %155 : vector<1x32xf32> to vector<16x32xf32>
    %186 = arith.mulf %184, %185 : vector<16x32xf32>
    %187 = vector.broadcast %156 : vector<1x32xf32> to vector<16x32xf32>
    %188 = arith.addf %186, %187 : vector<16x32xf32>
    %189 = vector.extract_strided_slice %15 {offsets = [12, 0], sizes = [1, 32], strides = [1, 1]} : vector<16x32xf32> to vector<1x32xf32>
    %cst_64 = arith.constant dense<0.000000e+00> : vector<1x16xf32>
    %190 = tpu.matmul %189, %188, %cst_64 {dimension_numbers = #tpu.dot_dimension_numbers<[1], [1], [0], [0], [0, 0, 1, 0], [], []>} : vector<1x32xf32>, vector<16x32xf32>, vector<1x16xf32> -> vector<1x16xf32>
    %cst_65 = arith.constant 0.000000e+00 : f32
    %191 = vector.broadcast %cst_65 : f32 to vector<2x16xf32>
    %192 = arith.cmpf ogt, %5, %191 : vector<2x16xf32>
    %cst_66 = arith.constant -1.000000e+30 : f32
    %193 = vector.shape_cast %190 : vector<1x16xf32> to vector<1x16xf32>
    %194 = vector.broadcast %193 : vector<1x16xf32> to vector<2x16xf32>
    %195 = vector.broadcast %cst_66 : f32 to vector<2x16xf32>
    %196 = arith.select %192, %194, %195 : vector<2x16xi1>, vector<2x16xf32>
    %cst_67 = arith.constant dense<0xFF800000> : vector<2xf32>
    %197 = vector.multi_reduction <maximumf>, %196, %cst_67 [1] : vector<2x16xf32> to vector<2xf32>
    %198 = vector.shape_cast %197 : vector<2xf32> to vector<2x1xf32>
    %199 = vector.broadcast %198 : vector<2x1xf32> to vector<2x16xf32>
    %200 = arith.subf %196, %199 : vector<2x16xf32>
    %201 = math.exp %200 : vector<2x16xf32>
    %202 = arith.mulf %201, %5 : vector<2x16xf32>
    %cst_68 = arith.constant dense<0.000000e+00> : vector<2xf32>
    %203 = vector.multi_reduction <add>, %202, %cst_68 [1] : vector<2x16xf32> to vector<2xf32>
    %204 = vector.shape_cast %203 : vector<2xf32> to vector<2x1xf32>
    %cst_69 = arith.constant 1.000000e-30 : f32
    %205 = vector.broadcast %cst_69 : f32 to vector<2x1xf32>
    %206 = arith.maximumf %204, %205 : vector<2x1xf32>
    %207 = tpu.reciprocal %206 {approx = true} : vector<2x1xf32> -> vector<2x1xf32>
    %208 = vector.broadcast %207 : vector<2x1xf32> to vector<2x16xf32>
    %209 = arith.mulf %202, %208 : vector<2x16xf32>
    %cst_70 = arith.constant dense<0.000000e+00> : vector<2x32xf32>
    %210 = tpu.matmul %209, %188, %cst_70 {dimension_numbers = #tpu.dot_dimension_numbers<[1], [0], [0], [1], [0, 0, 1, 1], [], []>} : vector<2x16xf32>, vector<16x32xf32>, vector<2x32xf32> -> vector<2x32xf32>
    %cst_71 = arith.constant dense<0.000000e+00> : vector<2x8xf32>
    %211 = tpu.matmul %210, %14, %cst_71 {dimension_numbers = #tpu.dot_dimension_numbers<[1], [0], [0], [1], [0, 0, 1, 1], [], []>} : vector<2x32xf32>, vector<32x8xf32>, vector<2x8xf32> -> vector<2x8xf32>
    %212 = vector.extract_strided_slice %15 {offsets = [13, 0], sizes = [1, 32], strides = [1, 1]} : vector<16x32xf32> to vector<1x32xf32>
    %213 = vector.extract_strided_slice %212 {offsets = [0, 0], sizes = [1, 8], strides = [1, 1]} : vector<1x32xf32> to vector<1x8xf32>
    %214 = vector.broadcast %213 : vector<1x8xf32> to vector<2x8xf32>
    %215 = arith.addf %211, %214 : vector<2x8xf32>
    %cst_72 = arith.constant dense<0xFF800000> : vector<2xf32>
    %216 = vector.multi_reduction <maximumf>, %215, %cst_72 [1] : vector<2x8xf32> to vector<2xf32>
    %217 = vector.shape_cast %216 : vector<2xf32> to vector<2x1xf32>
    %218 = vector.broadcast %217 : vector<2x1xf32> to vector<2x8xf32>
    %219 = arith.subf %215, %218 : vector<2x8xf32>
    %220 = math.exp %219 : vector<2x8xf32>
    %cst_73 = arith.constant dense<0.000000e+00> : vector<2xf32>
    %221 = vector.multi_reduction <add>, %220, %cst_73 [1] : vector<2x8xf32> to vector<2xf32>
    %222 = vector.shape_cast %221 : vector<2xf32> to vector<2x1xf32>
    %223 = math.log %222 : vector<2x1xf32>
    %224 = arith.addf %217, %223 : vector<2x1xf32>
    %225 = arith.mulf %7, %215 : vector<2x8xf32>
    %cst_74 = arith.constant dense<0.000000e+00> : vector<2xf32>
    %226 = vector.multi_reduction <add>, %225, %cst_74 [1] : vector<2x8xf32> to vector<2xf32>
    %227 = vector.shape_cast %226 : vector<2xf32> to vector<2x1xf32>
    %228 = arith.subf %224, %227 : vector<2x1xf32>
    %cst_75 = arith.constant dense<0.000000e+00> : vector<1xf32>
    %229 = vector.multi_reduction <add>, %228, %cst_75 [0] : vector<2x1xf32> to vector<1xf32>
    %230 = vector.shape_cast %229 : vector<1xf32> to vector<1x1xf32>
    %cst_76 = arith.constant 5.000000e-01 : f32
    %231 = vector.broadcast %cst_76 : f32 to vector<1x1xf32>
    %232 = arith.mulf %230, %231 : vector<1x1xf32>
    %233 = arith.cmpf oge, %227, %217 : vector<2x1xf32>
    %234 = arith.extui %233 : vector<2x1xi1> to vector<2x1xi32>
    %235 = arith.sitofp %234 : vector<2x1xi32> to vector<2x1xf32>
    %cst_77 = arith.constant dense<0.000000e+00> : vector<1xf32>
    %236 = vector.multi_reduction <add>, %235, %cst_77 [0] : vector<2x1xf32> to vector<1xf32>
    %237 = vector.shape_cast %236 : vector<1xf32> to vector<1x1xf32>
    %cst_78 = arith.constant 5.000000e-01 : f32
    %238 = vector.broadcast %cst_78 : f32 to vector<1x1xf32>
    %239 = arith.mulf %237, %238 : vector<1x1xf32>
    %cst_79 = arith.constant 0.000000e+00 : f32
    %240 = vector.broadcast %cst_79 : f32 to vector<2x1xf32>
    %241 = vector.broadcast %232 : vector<1x1xf32> to vector<2x1xf32>
    %242 = arith.addf %240, %241 : vector<2x1xf32>
    %243 = vector.broadcast %239 : vector<1x1xf32> to vector<2x1xf32>
    %244 = arith.addf %240, %243 : vector<2x1xf32>
    %245 = tpu.concatenate %215, %242, %244 in 1 : vector<2x8xf32>, vector<2x1xf32>, vector<2x1xf32> -> vector<2x10xf32>
    %cst_80 = arith.constant 0.000000e+00 : f32
    %246 = vector.broadcast %cst_80 : f32 to vector<8x128xf32>
    %c0_81 = arith.constant 0 : index
    %c0_82 = arith.constant 0 : index
    %247 = vector.load %arg2[%c0_81, %c0_82] : memref<8x128xf32, #tpu.memory_space<vmem>>, vector<8x128xf32>
    tpu.vector_store %arg2[%c0_81, %c0_82], %246 {strides = array<i32>} : memref<8x128xf32, #tpu.memory_space<vmem>>, vector<8x128xf32>,
    %c0_83 = arith.constant 0 : index
    %c0_84 = arith.constant 0 : index
    %248 = vector.load %arg2[%c0_83, %c0_84] : memref<8x128xf32, #tpu.memory_space<vmem>>, vector<2x10xf32>
    tpu.vector_store %arg2[%c0_83, %c0_84], %245 {strides = array<i32>} : memref<8x128xf32, #tpu.memory_space<vmem>>, vector<2x10xf32>,
    return
  }
}

</mosaic_0001>

<bundles_post_ra>
// kernel: hetero_gnn_forward.1
= control target key start
LH: loop header
LB: loop body
LE: loop exit
PB: predicated region body
PF: predicated region fallthrough
CT: control target
= control target key end

     0   :  { %vm67_vm0 = vcmask 261120   ;;  %vm153_vm1 = vcmask 130048   ;;  %vm235_vm2 = vcmask 392192   ;;  %v149_v19 = vlaneseq  ;;  %s2147_s25 = smov 1   ;;  %s2150_s14 = smov 32   ;;  %s2525_s1 = inlined_call_operand.vmem [shape: f32[192,64], index: 1, kind: input, shape index: {}]   ;;  %s2526_s0 = inlined_call_operand.vmem [shape: f32[136,128], index: 0, kind: input, shape index: {}]   ;;  %s2527_s2 = inlined_call_operand.vmem [shape: f32[8,128], index: 2, kind: output, shape index: {}]  }
   0x1   :  { %v31_v0 = vld [vmem:[%s2525_s1 + $0x18] sm:$0xff]  ;;  %v30_v1 = vld [vmem:[%s2525_s1 + $0x10] sm:$0xff]  ;;  %v24_v2 = vld [vmem:[%s2526_s0 + $0x68] sm:$0xff]  ;;  %v2145_v39 = vmov 0.0   ;;  %vm2146_vm3 = vmmov 0   ;;  %vm52_vm4 = vcmask 123904  }
   0x2   :  { %1952 = vmatprep.subr.mxu0 %v31_v0  ;;  %v29_v3 = vld [vmem:[%s2525_s1 + $0x8] sm:$0xff]  ;;  %1960 = vmatprep.mubr.msk.f32.mxu0 %vm67_vm0, %v24_v2  ;;  %v28_v4 = vld [vmem:[%s2525_s1] sm:$0xff]  ;;  %v25_v5 = vld [vmem:[%s2526_s0 + $0x70] sm:$0xff]  ;;  %v2231_v20 = vshrl.u32 %v149_v19, 7  ;;  %vm418_vm5 = vcmask 7168   ;;  %vm503_vm6 = vcmask 15360   ;;  %1834 = vst [vmem:[%s2527_s2] sm:$0xff] %v2145_v39 }
   0x3   :  { %1953 = vmatpush3.msra.mxu0 %v31_v0  ;;  %v2190_v6 = vld [vmem:[%s2526_s0] sm:$0xff]  ;;  %v2197_v9 = vld [vmem:[%s2526_s0 + $0x8] sm:$0xff]  ;;  %v26_v11 = vld [vmem:[%s2526_s0 + $0x78] sm:$0xff]  ;;  %vm510_vm7 = vcmask 1041408   ;;  %s2151_s23 = smov 96   ;;  %vm1791_vm13 = vcmask 58368  }
   0x4   :  { %1954 = vmatprep.subr.mxu0 %v30_v1  ;;  %1967 = vmatprep.mubr.msk.f32.mxu1 %vm153_vm1, %v2190_v6  ;;  %v37_v10 = vld [vmem:[%s2525_s1 + $0x48] sm:$0xff]  ;;  %v36_v12 = vld [vmem:[%s2525_s1 + $0x40] sm:$0xff]  ;;  %v35_v13 = vld [vmem:[%s2525_s1 + $0x38] sm:$0xff]  ;;  %v2234_v21 = vsub.s32 0, %v2231_v20  ;;  %v319_v48 = vsub.s32 1, %v2231_v20  ;;  %vm1830_vm15 = vcmask 64512  }
   0x5   :  { %1955 = vmatpush3.msra.mxu0 %v30_v1  ;;  %v34_v14 = vld [vmem:[%s2525_s1 + $0x30] sm:$0xff]  ;;  %v33_v15 = vld [vmem:[%s2525_s1 + $0x28] sm:$0xff]  ;;  %v32_v16 = vld [vmem:[%s2525_s1 + $0x20] sm:$0xff] }
   0x6   :  { %1956 = vmatprep.subr.mxu0 %v29_v3  ;;  %v27_v17 = vld [vmem:[%s2526_s0 + $0x80] sm:$0xff]  ;;  %v13_v18 = vld [vmem:[%s2526_s0 + $0x10] sm:$0xff]  ;;  %v14_v38 = vld [vmem:[%s2526_s0 + $0x18] sm:$0xff] }
   0x7   :  { %1957 = vmatpush3.msra.mxu0 %v29_v3  ;;  %v2239_v22 = vld [vmem:[%s2525_s1 + $0xb0] sm:$0xff]  ;;  %v22_v62 = vld [vmem:[%s2526_s0 + $0x58] sm:$0x3] }
   0x8   :  { %1958 = vmatprep.subr.mxu0 %v28_v4  ;;  %v152_v23 = vrot.slane %v2239_v22, %v2234_v21  ;;  %v2270_v40 = vld [vmem:[%s2526_s0 + $0x50] sm:$0x3]  ;;  %v320_v49 = vrot.slane %v2239_v22, %v319_v48  ;;  %v57_v63 = vsel %vm52_vm4, %v22_v62, 0.0 }
   0x9   :  { %1959 = vmatpush3.msra.mxu0 %v28_v4  ;;  %v53_v41 = vsel %vm52_vm4, %v2270_v40, 0.0  ;;  %v2304_v3 = vld [vmem:[%s2526_s0 + $0x30] sm:$0xff]  ;;  %vm1622_vm12 = vcmp.gt.f32.partialorder %v2270_v40, 0.0 }
   0xa   :  { %1961 = vmatmul.mubr.msk.f32.vlgmr.msra.gmra.mxu0 %vm67_vm0, %v25_v5  ;;  %1992 = vmatprep.subr.mxu0 %v2145_v39 }
   0xb   :  { %1996 = vmatprep.mubr.msk.f32.mxu0 %vm2146_vm3, %v2145_v39 }
  0xca   :  { %v1962_v7 = vpop.f32.mrf.mxu0 }
  0xcb   :  { %1963 = vmatprep.subr.mxu1 %v1962_v7 }
  0xcc   :  { %v140_v8 = vpop.f32.mrf.mxu0  ;;  %1964 = vmatpush3.msra.mxu1 %v1962_v7 }
  0xcd   :  { %1965 = vmatprep.subr.mxu1 %v140_v8 }
  0xce   :  { %1966 = vmatpush3.msra.mxu1 %v140_v8 }
  0xcf   :  { %1968 = vmatmul.mubr.msk.f32.vlgmr.msra.gmra.mxu1 %vm153_vm1, %v2197_v9  ;;  %1970 = vmatprep.subr.mxu1 %v37_v10 }
  0xd0   :  { %1971 = vmatpush3.msra.mxu1 %v37_v10  ;;  %1982 = vmatprep.mubr.msk.f32.mxu1 %vm235_vm2, %v26_v11 }
  0xd1   :  { %1972 = vmatprep.subr.mxu1 %v36_v12 }
  0xd2   :  { %1973 = vmatpush3.msra.mxu1 %v36_v12 }
  0xd3   :  { %1974 = vmatprep.subr.mxu1 %v35_v13 }
  0xd4   :  { %1975 = vmatpush3.msra.mxu1 %v35_v13 }
  0xd5   :  { %1976 = vmatprep.subr.mxu1 %v34_v14 }
  0xd6   :  { %1977 = vmatpush3.msra.mxu1 %v34_v14 }
  0xd7   :  { %1978 = vmatprep.subr.mxu1 %v33_v15 }
  0xd8   :  { %1979 = vmatpush3.msra.mxu1 %v33_v15 }
  0xd9   :  { %1980 = vmatprep.subr.mxu1 %v32_v16 }
  0xda   :  { %1981 = vmatpush3.msra.mxu1 %v32_v16 }
  0xdb   :  { %1983 = vmatmul.mubr.msk.f32.vlgmr.msra.gmra.mxu1 %vm235_vm2, %v27_v17  ;;  %v2148_v17 = vmov 0  }
  0xdc   :  { %1989 = vmatprep.mubr.msk.f32.mxu1 %vm153_vm1, %v13_v18  ;;  %2103 = vset.pattern.permute.xlu1 %v2148_v17 }
  0xdd   :  { %2106 = vset.pattern.permute.xlu0 %v2148_v17 }
 0x18f   :  { %v1969_v24 = vpop.f32.mrf.mxu1 }
 0x190   :  { %v232_v25 = vadd.f32 %v1969_v24, %v152_v23 }
 0x191   :  { %v226_v26 = vpop.f32.mrf.mxu1 }
 0x192   :  { %v2243_v27 = vmax.f32 %v232_v25, 0.0  ;;  %v227_v28 = vadd.f32 %v226_v26, %v152_v23  ;;  %v2322_v25 = vld [vmem:[%s2526_s0 + $0x38] sm:$0xff] }
 0x194   :  { %v2245_v29 = vmax.f32 %v227_v28, 0.0  ;;  %v407_v30 = vsel %vm67_vm0, %v2243_v27, 0.0  ;;  %v411_v31 = vmul.f32 %v2243_v27, %v2243_v27 }
 0x195   :  { %408 = vadd.xlane.f32.xlu0 %v407_v30 }
 0x196   :  { %v404_v32 = vsel %vm67_vm0, %v2245_v29, 0.0  ;;  %v415_v33 = vsel %vm67_vm0, %v411_v31, 0.0  ;;  %v410_v34 = vmul.f32 %v2245_v29, %v2245_v29  ;;  %v19_v31 = vld [vmem:[%s2526_s0 + $0x40] sm:$0xff] }
 0x197   :  { %405 = vadd.xlane.f32.xlu1 %v404_v32 }
 0x198   :  { %v412_v35 = vsel %vm67_vm0, %v410_v34, 0.0 }
 0x199   :  { %416 = vadd.xlane.f32.xlu0 %v415_v33 }
 0x19b   :  { %v1984_v36 = vpop.f32.mrf.mxu1  ;;  %413 = vadd.xlane.f32.xlu1 %v412_v35 }
 0x19c   :  { %1985 = vmatprep.subr.mxu1 %v1984_v36 }
 0x19d   :  { %v308_v37 = vpop.f32.mrf.mxu1  ;;  %1986 = vmatpush3.msra.mxu1 %v1984_v36  ;;  %54 = vadd.xlane.f32.xlu0 %v53_v41 }
 0x19e   :  { %1987 = vmatprep.subr.mxu1 %v308_v37 }
 0x19f   :  { %1988 = vmatpush3.msra.mxu1 %v308_v37 }
 0x1a0   :  { %1990 = vmatmul.mubr.msk.f32.vlgmr.msra.gmra.mxu1 %vm153_vm1, %v14_v38  ;;  %2004 = vmatprep.subr.mxu1 %v2145_v39 }
 0x1a1   :  { %2008 = vmatprep.mubr.msk.f32.mxu1 %vm2146_vm3, %v2145_v39 }
 0x21e   :  { %v409_v42 = vpop.xlane.xlu0 %408 }
 0x220   :  { %v406_v43 = vpop.xlane.xlu1 %405 }
 0x222   :  { %v417_v44 = vpop.xlane.xlu0 %416 }
 0x223   :  { %v420_v45 = vsel %vm418_vm5, %v409_v42, %v417_v44  ;;  %v2149_v44 = vmov 1  }
 0x224   :  { %1993 = vmatpush3.msra.mxu0 %v420_v45  ;;  %v414_v46 = vpop.xlane.xlu1 %413 }
 0x225   :  { %v419_v47 = vsel %vm418_vm5, %v406_v43, %v414_v46  ;;  %1994 = vmatprep.subr.mxu0 %v2145_v39 }
 0x226   :  { %1995 = vmatpush3.msra.mxu0 %v419_v47  ;;  %v55_v0 = vpop.xlane.xlu0 %54 }
 0x227   :  { %1997 = vmatmul.mubr.msk.f32.vlgmr.msra.gmra.mxu0 %vm153_vm1, %v2270_v40  ;;  %v56_v1 = vmax.f32 %v55_v0, 1.0 }
 0x228   :  { %2001 = vmatprep.mubr.msk.f32.mxu0 %vm503_vm6, %v2304_v3 }
 0x229   :  { %v61_v2 = vmul.f32 32.0, %v56_v1 }
 0x22b   :  { %2113 = vrcp.f32 %v61_v2 }
 0x238   :  { %v2306_v4 = vpop.eup %2113 }
 0x260   :  { %v1991_v50 = vpop.f32.mrf.mxu1 }
 0x261   :  { %v399_v51 = vadd.f32 %v1991_v50, %v320_v49  ;;  %v41_v50 = vld [vmem:[%s2525_s1 + $0x68] sm:$0xff] }
 0x262   :  { %v393_v52 = vpop.f32.mrf.mxu1 }
 0x263   :  { %v2283_v53 = vmax.f32 %v399_v51, 0.0  ;;  %v394_v54 = vadd.f32 %v393_v52, %v320_v49  ;;  %v20_v49 = vld [vmem:[%s2526_s0 + $0x48] sm:$0xff]  ;;  %v40_v52 = vld [vmem:[%s2525_s1 + $0x60] sm:$0xff] }
 0x265   :  { %v2285_v55 = vmax.f32 %v394_v54, 0.0  ;;  %v634_v56 = vsel %vm67_vm0, %v2283_v53, 0.0  ;;  %v638_v57 = vmul.f32 %v2283_v53, %v2283_v53  ;;  %v39_v54 = vld [vmem:[%s2525_s1 + $0x58] sm:$0xff] }
 0x266   :  { %635 = vadd.xlane.f32.xlu1 %v634_v56 }
 0x267   :  { %v642_v58 = vsel %vm67_vm0, %v638_v57, 0.0  ;;  %v637_v59 = vmul.f32 %v2285_v55, %v2285_v55  ;;  %v631_v60 = vsel %vm67_vm0, %v2285_v55, 0.0  ;;  %v38_v57 = vld [vmem:[%s2525_s1 + $0x50] sm:$0xff] }
 0x268   :  { %643 = vadd.xlane.f32.xlu0 %v642_v58  ;;  %v619_v58 = vsub.s32 2, %v2231_v20 }
 0x269   :  { %v639_v61 = vsel %vm67_vm0, %v637_v59, 0.0 }
 0x26a   :  { %632 = vadd.xlane.f32.xlu1 %v631_v60  ;;  %v625_v60 = vsub.s32 3, %v2231_v20 }
 0x26c   :  { %640 = vadd.xlane.f32.xlu0 %v639_v61  ;;  %v626_v0 = vrot.slane %v2239_v22, %v625_v60 }
 0x270   :  { %58 = vadd.xlane.f32.xlu0 %v57_v63 }
 0x2e7   :  { %v490_v5 = vpop.f32.mrf.mxu0 }
 0x2e8   :  { %v494_v7 = vmul.f32 %v2306_v4, %v490_v5 }
 0x2e9   :  { %v1998_v8 = vpop.f32.mrf.mxu0 }
 0x2ea   :  { %v495_v10 = vmul.f32 %v494_v7, %v494_v7 }
 0x2ec   :  { %497 = vrot.lane.b32.xlu1 %v495_v10, %s2147_s25 }
 0x2ef   :  { %v636_v11 = vpop.xlane.xlu1 %635 }
 0x2f1   :  { %v644_v12 = vpop.xlane.xlu0 %643 }
 0x2f2   :  { %v646_v13 = vsel %vm418_vm5, %v636_v11, %v644_v12 }
 0x2f3   :  { %2005 = vmatpush3.msra.mxu1 %v646_v13  ;;  %v633_v14 = vpop.xlane.xlu1 %632 }
 0x2f4   :  { %2006 = vmatprep.subr.mxu1 %v2145_v39 }
 0x2f5   :  { %v641_v15 = vpop.xlane.xlu0 %640 }
 0x2f6   :  { %v645_v16 = vsel %vm418_vm5, %v633_v14, %v641_v15 }
 0x2f7   :  { %2007 = vmatpush3.msra.mxu1 %v645_v16  ;;  %v2376_v16 = vld [vmem:[%s2525_s1 + $0xb8] sm:$0xff] }
 0x2f8   :  { %2009 = vmatmul.mubr.msk.f32.vlgmr.msra.gmra.mxu1 %vm153_vm1, %v22_v62  ;;  %2016 = vmatprep.subr.mxu1 %v41_v50  ;;  %v620_v62 = vrot.slane %v2239_v22, %v619_v58 }
 0x2f9   :  { %v59_v26 = vpop.xlane.xlu0 %58  ;;  %2017 = vmatpush3.msra.mxu1 %v41_v50 }
 0x2fa   :  { %v60_v28 = vmax.f32 %v59_v26, 1.0  ;;  %2018 = vmatprep.subr.mxu1 %v40_v52 }
 0x2fb   :  { %2019 = vmatpush3.msra.mxu1 %v40_v52 }
 0x2fc   :  { %v64_v30 = vmul.f32 32.0, %v60_v28  ;;  %2020 = vmatprep.subr.mxu1 %v39_v54  ;;  %v843_v28 = vsub.s32 4, %v2231_v20 }
 0x2fd   :  { %2021 = vmatpush3.msra.mxu1 %v39_v54 }
 0x2fe   :  { %2115 = vrcp.f32 %v64_v30  ;;  %2022 = vmatprep.subr.mxu1 %v38_v57 }
 0x2ff   :  { %2023 = vmatpush3.msra.mxu1 %v38_v57 }
 0x300   :  { %2045 = vmatprep.subr.mxu1 %v2145_v39 }
 0x30b   :  { %v2116_v32 = vpop.eup %2115 }
 0x35e   :  { %v498_v18 = vpop.permute.xlu1 %497 }
 0x35f   :  { %v500_v19 = vsub.f32 %v494_v7, %v498_v18 }
 0x361   :  { %v501_v23 = vmax.f32 %v500_v19, 0.0  ;;  %v1097_v19 = vrot.slane %v2376_v16, %v319_v48 }
 0x363   :  { %v502_v24 = vsel %vm418_vm5, %v494_v7, %v501_v23 }
 0x364   :  { %1999 = vmatprep.subr.msk.mxu0 %vm510_vm7, %v502_v24 }
 0x365   :  { %2000 = vmatpush3.msk.msra.mxu0 %vm510_vm7, %v502_v24 }
 0x366   :  { %2002 = vmatmul.mubr.msk.f32.vlgmr.msra.gmra.mxu0 %vm503_vm6, %v2322_v25 }
 0x367   :  { %2013 = vmatprep.mubr.msk.f32.mxu0 %vm503_vm6, %v19_v31  ;;  %v45_v31 = vld [vmem:[%s2525_s1 + $0x88] sm:$0xff] }
 0x3b8   :  { %v716_v33 = vpop.f32.mrf.mxu1 }
 0x3b9   :  { %v720_v34 = vmul.f32 %v2116_v32, %v716_v33  ;;  %v844_v32 = vrot.slane %v2239_v22, %v843_v28  ;;  %v849_v33 = vsub.s32 5, %v2231_v20 }
 0x3ba   :  { %v2010_v35 = vpop.f32.mrf.mxu1 }
 0x3bb   :  { %v721_v36 = vmul.f32 %v720_v34, %v720_v34 }
 0x3bd   :  { %723 = vrot.lane.b32.xlu0 %v721_v36, %s2147_s25 }
 0x426   :  { %v2003_v37 = vpop.f32.mrf.mxu0 }
 0x427   :  { %596 = vperm.xlu1 %2103, %v2003_v37   ;;  %v602_v42 = vadd.f32 1e-05, %v2003_v37 }
 0x428   :  { %v580_v38 = vpop.f32.mrf.mxu0 }
 0x429   :  { %v601_v41 = vadd.f32 1e-05, %v580_v38 }
 0x42b   :  { %2117 = vrsqrt.f32 %v601_v41  ;;  %591 = vperm.xlu1 %2103, %v580_v38   ;;  %v850_v41 = vrot.slane %v2239_v22, %v849_v33 }
 0x42c   :  { %2119 = vrsqrt.f32 %v602_v42 }
 0x42f   :  { %v724_v43 = vpop.permute.xlu0 %723  ;;  %2104 = vset.pattern.permute.xlu1 %v2149_v44 }
 0x430   :  { %v726_v45 = vsub.f32 %v720_v34, %v724_v43 }
 0x432   :  { %v727_v46 = vmax.f32 %v726_v45, 0.0 }
 0x434   :  { %v728_v47 = vsel %vm418_vm5, %v720_v34, %v727_v46  ;;  %v44_v34 = vld [vmem:[%s2525_s1 + $0x80] sm:$0xff] }
 0x435   :  { %2011 = vmatprep.subr.msk.mxu0 %vm510_vm7, %v728_v47 }
 0x436   :  { %2012 = vmatpush3.msk.msra.mxu0 %vm510_vm7, %v728_v47 }
 0x437   :  { %2014 = vmatmul.mubr.msk.f32.vlgmr.msra.gmra.mxu0 %vm503_vm6, %v20_v49 }
 0x438   :  { %v2118_v51 = vpop.eup %2117  ;;  %2031 = vmatprep.mubr.msk.f32.mxu0 %vm153_vm1, %v2190_v6 }
 0x439   :  { %607 = vperm.xlu1 %2104, %v2118_v51   ;;  %v2120_v56 = vpop.eup %2119 }
 0x43d   :  { %612 = vperm.xlu1 %2104, %v2120_v56  }
 0x441   :  { %2105 = vset.pattern.permute.xlu1 %v2148_v17 }
 0x4a2   :  { %v597_v6 = vpop.permute.xlu1 %596 }
 0x4a3   :  { %v600_v2 = vsub.f32 %v2243_v27, %v597_v6 }
 0x4a6   :  { %v592_v59 = vpop.permute.xlu1 %591 }
 0x4a7   :  { %v599_v61 = vsub.f32 %v2245_v29, %v592_v59 }
 0x4b4   :  { %v608_v63 = vpop.permute.xlu1 %607 }
 0x4b5   :  { %v615_v1 = vmul.f32 %v608_v63, %v599_v61 }
 0x4b7   :  { %v621_v5 = vmul.f32 %v620_v62, %v615_v1 }
 0x4b8   :  { %v613_v7 = vpop.permute.xlu1 %612 }
 0x4b9   :  { %v627_v8 = vadd.f32 %v626_v0, %v621_v5  ;;  %v616_v10 = vmul.f32 %v613_v7, %v600_v2 }
 0x4bb   :  { %v622_v11 = vmul.f32 %v620_v62, %v616_v10  ;;  %2024 = vmatprep.mubr.msk.f32.mxu1 %vm67_vm0, %v627_v8  ;;  %v16_v8 = vld [vmem:[%s2526_s0 + $0x28] sm:$0xff] }
 0x4bc   :  { %vm1210_vm11 = vcmp.gt.f32.partialorder %v16_v8, 0.0 }
 0x4bd   :  { %v628_v29 = vadd.f32 %v626_v0, %v622_v11  ;;  %v15_v0 = vld [vmem:[%s2526_s0 + $0x20] sm:$0xff] }
 0x4be   :  { %vm1209_vm8 = vcmp.gt.f32.partialorder %v15_v0, 0.0 }
 0x4bf   :  { %2025 = vmatmul.mubr.msk.f32.vlgmr.msra.gmra.mxu1 %vm67_vm0, %v628_v29 }
 0x4c0   :  { %2049 = vmatprep.mubr.msk.f32.mxu1 %vm2146_vm3, %v2145_v39 }
 0x4f7   :  { %v2015_v12 = vpop.f32.mrf.mxu0 }
 0x4f8   :  { %v826_v13 = vadd.f32 1e-05, %v2015_v12  ;;  %820 = vperm.xlu1 %2105, %v2015_v12  }
 0x4f9   :  { %v804_v14 = vpop.f32.mrf.mxu0 }
 0x4fa   :  { %2121 = vrsqrt.f32 %v826_v13  ;;  %v825_v15 = vadd.f32 1e-05, %v804_v14  ;;  %815 = vperm.xlu0 %2106, %v804_v14  }
 0x4fc   :  { %2123 = vrsqrt.f32 %v825_v15  ;;  %2107 = vset.pattern.permute.xlu1 %v2149_v44 }
 0x4fe   :  { %2108 = vset.pattern.permute.xlu0 %v2149_v44 }
 0x507   :  { %v2122_v27 = vpop.eup %2121 }
 0x508   :  { %836 = vperm.xlu0 %2108, %v2122_v27  }
 0x509   :  { %v2124_v18 = vpop.eup %2123 }
 0x50a   :  { %831 = vperm.xlu1 %2107, %v2124_v18  }
 0x50c   :  { %2109 = vset.pattern.permute.xlu0 %v2148_v17 }
 0x50e   :  { %1099 = vrot.lane.b32.xlu1 %v1097_v19, %s2150_s14 }
 0x50f   :  { %2110 = vset.pattern.permute.xlu1 %v2148_v17 }
 0x573   :  { %v821_v23 = vpop.permute.xlu1 %820 }
 0x574   :  { %v824_v48 = vsub.f32 %v2283_v53, %v821_v23  ;;  %v43_v53 = vld [vmem:[%s2525_s1 + $0x78] sm:$0xff] }
 0x575   :  { %v816_v24 = vpop.permute.xlu0 %815 }
 0x576   :  { %v823_v35 = vsub.f32 %v2285_v55, %v816_v24  ;;  %v42_v55 = vld [vmem:[%s2525_s1 + $0x70] sm:$0xff] }
 0x57f   :  { %v2026_v26 = vpop.f32.mrf.mxu1 }
 0x580   :  { %2027 = vmatprep.subr.mxu0 %v2026_v26 }
 0x581   :  { %v925_v30 = vpop.f32.mrf.mxu1  ;;  %2028 = vmatpush3.msra.mxu0 %v2026_v26 }
 0x582   :  { %2029 = vmatprep.subr.mxu0 %v925_v30 }
 0x583   :  { %v837_v17 = vpop.permute.xlu0 %836  ;;  %2030 = vmatpush3.msra.mxu0 %v925_v30 }
 0x584   :  { %v840_v36 = vmul.f32 %v837_v17, %v824_v48  ;;  %2032 = vmatmul.mubr.msk.f32.vlgmr.msra.gmra.mxu0 %vm153_vm1, %v2197_v9  ;;  %2034 = vmatprep.subr.mxu0 %v45_v31 }
 0x585   :  { %v832_v37 = vpop.permute.xlu1 %831  ;;  %2035 = vmatpush3.msra.mxu0 %v45_v31 }
 0x586   :  { %v839_v38 = vmul.f32 %v832_v37, %v823_v35  ;;  %2036 = vmatprep.subr.mxu0 %v44_v34  ;;  %v846_v42 = vmul.f32 %v844_v32, %v840_v36 }
 0x587   :  { %2037 = vmatpush3.msra.mxu0 %v44_v34 }
 0x588   :  { %v845_v9 = vmul.f32 %v844_v32, %v839_v38  ;;  %2038 = vmatprep.subr.mxu0 %v43_v53  ;;  %v852_v49 = vadd.f32 %v850_v41, %v846_v42 }
 0x589   :  { %v1100_v43 = vpop.permute.xlu1 %1099  ;;  %2039 = vmatpush3.msra.mxu0 %v43_v53 }
 0x58a   :  { %v851_v45 = vadd.f32 %v850_v41, %v845_v9  ;;  %v1102_v46 = vmul.f32 %v1100_v43, %v925_v30  ;;  %v1103_v47 = vmul.f32 %v2026_v26, %v1100_v43  ;;  %2040 = vmatprep.subr.mxu0 %v42_v55  ;;  %v936_v9 = vsub.s32 6, %v2231_v20 }
 0x58b   :  { %2041 = vmatpush3.msra.mxu0 %v42_v55 }
 0x58c   :  { %2042 = vmatprep.mubr.msk.f32.mxu0 %vm67_vm0, %v851_v45  ;;  %1108 = vrot.lane.b32.xlu0 %v1103_v47, %s2151_s23  ;;  %v937_v43 = vrot.slane %v2239_v22, %v936_v9  ;;  %v1324_v45 = vsub.s32 7, %v2231_v20 }
 0x58d   :  { %1106 = vrot.lane.b32.xlu1 %v1102_v46, %s2151_s23  ;;  %2043 = vmatmul.mubr.msk.f32.vlgmr.msra.gmra.mxu0 %vm67_vm0, %v852_v49 }
 0x58e   :  { %v1325_v47 = vrot.slane %v2239_v22, %v1324_v45 }
 0x5fe   :  { %v1109_v50 = vpop.permute.xlu0 %1108 }
 0x5ff   :  { %v1107_v51 = vpop.permute.xlu1 %1106  ;;  %v1115_v52 = vsel %vm67_vm0, %v1109_v50, 0.0 }
 0x600   :  { %1116 = vadd.xlane.f32.xlu0 %v1115_v52  ;;  %v1112_v54 = vsel %vm67_vm0, %v1107_v51, 0.0 }
 0x601   :  { %1113 = vadd.xlane.f32.xlu1 %v1112_v54 }
 0x644   :  { %v2409_v56 = vpop.f32.mrf.mxu0 }
 0x645   :  { %v1010_v46 = vadd.f32 %v2409_v56, %v937_v43 }
 0x646   :  { %v2411_v57 = vpop.f32.mrf.mxu0 }
 0x647   :  { %v1005_v50 = vadd.f32 %v2411_v57, %v937_v43 }
 0x64d   :  { %v2044_v6 = vpop.f32.mrf.mxu0 }
 0x64e   :  { %2046 = vmatpush3.xpose.msk.msra.mxu1 %vm67_vm0, %v2044_v6  ;;  %2052 = vmatprep.subr.mxu0 %v2044_v6 }
 0x64f   :  { %v1085_v59 = vpop.f32.mrf.mxu0  ;;  %2053 = vmatpush3.msra.mxu0 %v2044_v6  ;;  %2047 = vmatprep.subr.mxu1 %v2145_v39 }
 0x650   :  { %2054 = vmatprep.subr.mxu0 %v1085_v59 }
 0x651   :  { %2055 = vmatpush3.msra.mxu0 %v1085_v59 }
 0x652   :  { %2048 = vmatpush3.xpose.msk.msra.mxu1 %vm67_vm0, %v1085_v59 }
 0x653   :  { %2059 = vmatprep.subr.mxu1 %v2145_v39 }
 0x655   :  { %2050 = vmatmul.mubr.msk.f32.vlgmr.msra.gmra.mxu1 %vm67_vm0, %v2376_v16 }
 0x656   :  { %2063 = vmatprep.mubr.msk.f32.mxu1 %vm2146_vm3, %v2145_v39 }
 0x689   :  { %v1117_v62 = vpop.xlane.xlu0 %1116 }
 0x68a   :  { %v1114_v1 = vpop.xlane.xlu1 %1113 }
 0x715   :  { %v1193_v61 = vpop.f32.mrf.mxu1 }
 0x716   :  { %v1200_v63 = vrot.slane %v1193_v61, %v2234_v21 }
 0x717   :  { %v2051_v2 = vpop.f32.mrf.mxu1 }
 0x718   :  { %v1201_v5 = vadd.f32 %v1200_v63, %v1114_v1  ;;  %v1202_v7 = vadd.f32 %v1200_v63, %v1117_v62 }
 0x71a   :  { %vm1203_vm9 = vcmp.ge.f32.partialorder %v1201_v5, 0.0  ;;  %v1205_v10 = vmul.f32 0.2, %v1201_v5  ;;  %vm1204_vm10 = vcmp.ge.f32.partialorder %v1202_v7, 0.0  ;;  %v1206_v11 = vmul.f32 0.2, %v1202_v7 }
 0x71c   :  { %v1207_v29 = vsel %vm1203_vm9, %v1201_v5, %v1205_v10  ;;  %v1208_v12 = vsel %vm1204_vm10, %v1202_v7, %v1206_v11 }
 0x71d   :  { %v1211_v13 = vsel %vm1209_vm8, %v1207_v29, -1e+30  ;;  %v1212_v15 = vsel %vm1210_vm11, %v1208_v12, -1e+30 }
 0x71e   :  { %v1213_v14 = vsel %vm153_vm1, %v1211_v13, -inf  ;;  %v1216_v27 = vsel %vm153_vm1, %v1212_v15, -inf }
 0x71f   :  { %1214 = vmax.xlane.f32.xlu0 %v1213_v14 }
 0x723   :  { %1217 = vmax.xlane.f32.xlu0 %v1216_v27 }
 0x7a8   :  { %v1215_v18 = vpop.xlane.xlu0 %1214 }
 0x7a9   :  { %v1219_v19 = vsub.f32 %v1211_v13, %v1215_v18 }
 0x7ab   :  { %v1221_v23 = vmul.f32 1.442695, %v1219_v19 }
 0x7ac   :  { %v1218_v24 = vpop.xlane.xlu0 %1217 }
 0x7ad   :  { %2125 = vpow2.f32 %v1221_v23  ;;  %v1220_v26 = vsub.f32 %v1212_v15, %v1218_v24 }
 0x7af   :  { %v1223_v28 = vmul.f32 1.442695, %v1220_v26 }
 0x7b1   :  { %2127 = vpow2.f32 %v1223_v28 }
 0x7ba   :  { %v2126_v30 = vpop.eup %2125 }
 0x7bb   :  { %v1225_v31 = vmul.f32 %v2126_v30, %v15_v0 }
 0x7bd   :  { %v1227_v48 = vsel %vm153_vm1, %v1225_v31, 0.0 }
 0x7be   :  { %v2128_v32 = vpop.eup %2127  ;;  %1228 = vadd.xlane.f32.xlu1 %v1227_v48  ;;  %v1534_v48 = vrot.slane %v2376_v16, %v619_v58 }
 0x7bf   :  { %v1226_v17 = vmul.f32 %v2128_v32, %v16_v8 }
 0x7c1   :  { %v1230_v34 = vsel %vm153_vm1, %v1226_v17, 0.0 }
 0x7c2   :  { %1231 = vadd.xlane.f32.xlu0 %v1230_v34 }
 0x847   :  { %v1229_v35 = vpop.xlane.xlu1 %1228 }
 0x848   :  { %v1233_v36 = vmax.f32 %v1229_v35, 1e-30 }
 0x84a   :  { %2129 = vrcp.f32 %v1233_v36 }
 0x84b   :  { %v1232_v37 = vpop.xlane.xlu0 %1231 }
 0x84c   :  { %v1234_v53 = vmax.f32 %v1232_v37, 1e-30 }
 0x84e   :  { %2131 = vrcp.f32 %v1234_v53 }
 0x857   :  { %v2130_v38 = vpop.eup %2129 }
 0x858   :  { %v1237_v41 = vmul.f32 %v2130_v38, %v1225_v31 }
 0x85a   :  { %2056 = vmatprep.mubr.msk.f32.mxu0 %vm153_vm1, %v1237_v41  ;;  %v1543_v41 = vrot.slane %v2376_v16, 4 }
 0x85b   :  { %v2132_v42 = vpop.eup %2131 }
 0x85c   :  { %v1238_v55 = vmul.f32 %v2132_v42, %v1226_v17  ;;  %v1540_v17 = vrot.slane %v2376_v16, %v625_v60 }
 0x85e   :  { %2057 = vmatmul.mubr.msk.f32.vlgmr.msra.gmra.mxu0 %vm153_vm1, %v1238_v55 }
 0x85f   :  { %2068 = vmatprep.mubr.msk.f32.mxu0 %vm503_vm6, %v2304_v3 }
 0x91e   :  { %v2058_v49 = vpop.f32.mrf.mxu0 }
 0x91f   :  { %v1321_v51 = vadd.f32 %v2058_v49, %v1010_v46 }
 0x920   :  { %v1311_v52 = vpop.f32.mrf.mxu0 }
 0x921   :  { %v1327_v54 = vadd.f32 %v1325_v47, %v1321_v51  ;;  %v1320_v6 = vadd.f32 %v1311_v52, %v1005_v50 }
 0x923   :  { %v1329_v59 = vmax.f32 %v1327_v54, 0.0  ;;  %v1326_v61 = vadd.f32 %v1325_v47, %v1320_v6 }
 0x925   :  { %v2442_v3 = vmax.f32 %v1326_v61, 0.0  ;;  %v1333_v62 = vsel %vm67_vm0, %v1329_v59, 0.0  ;;  %v1337_v63 = vmul.f32 %v1329_v59, %v1329_v59  ;;  %v48_v61 = vld [vmem:[%s2525_s1 + $0xa0] sm:$0xff] }
 0x926   :  { %1334 = vadd.xlane.f32.xlu1 %v1333_v62 }
 0x927   :  { %v1341_v0 = vsel %vm67_vm0, %v1337_v63, 0.0  ;;  %v1336_v22 = vmul.f32 %v2442_v3, %v2442_v3  ;;  %v1330_v56 = vsel %vm67_vm0, %v2442_v3, 0.0 }
 0x928   :  { %1342 = vadd.xlane.f32.xlu0 %v1341_v0  ;;  %v1717_v0 = vrot.slane %v2376_v16, %v849_v33 }
 0x929   :  { %v1338_v57 = vsel %vm67_vm0, %v1336_v22, 0.0 }
 0x92a   :  { %1331 = vadd.xlane.f32.xlu1 %v1330_v56 }
 0x92c   :  { %1339 = vadd.xlane.f32.xlu0 %v1338_v57 }
 0x9af   :  { %v1335_v1 = vpop.xlane.xlu1 %1334 }
 0x9b1   :  { %v1343_v2 = vpop.xlane.xlu0 %1342 }
 0x9b2   :  { %v1345_v5 = vsel %vm418_vm5, %v1335_v1, %v1343_v2 }
 0x9b3   :  { %2060 = vmatpush3.msra.mxu1 %v1345_v5  ;;  %v1332_v7 = vpop.xlane.xlu1 %1331 }
 0x9b4   :  { %2061 = vmatprep.subr.mxu1 %v2145_v39 }
 0x9b5   :  { %v1340_v8 = vpop.xlane.xlu0 %1339 }
 0x9b6   :  { %v1344_v10 = vsel %vm418_vm5, %v1332_v7, %v1340_v8  ;;  %v23_v8 = vld [vmem:[%s2526_s0 + $0x60] sm:$0x3] }
 0x9b7   :  { %2062 = vmatpush3.msra.mxu1 %v1344_v10 }
 0x9b8   :  { %2064 = vmatmul.mubr.msk.f32.vlgmr.msra.gmra.mxu1 %vm153_vm1, %v2270_v40  ;;  %2071 = vmatprep.subr.mxu1 %v2145_v39 }
 0x9b9   :  { %2075 = vmatprep.mubr.msk.f32.mxu1 %vm2146_vm3, %v2145_v39 }
 0xa78   :  { %v1412_v11 = vpop.f32.mrf.mxu1 }
 0xa79   :  { %v1416_v29 = vmul.f32 %v2306_v4, %v1412_v11 }
 0xa7a   :  { %v2065_v12 = vpop.f32.mrf.mxu1 }
 0xa7b   :  { %v1417_v13 = vmul.f32 %v1416_v29, %v1416_v29 }
 0xa7d   :  { %1419 = vrot.lane.b32.xlu1 %v1417_v13, %s2147_s25 }
 0xaef   :  { %v1420_v14 = vpop.permute.xlu1 %1419 }
 0xaf0   :  { %v1422_v15 = vsub.f32 %v1416_v29, %v1420_v14 }
 0xaf2   :  { %v1423_v27 = vmax.f32 %v1422_v15, 0.0 }
 0xaf4   :  { %v1424_v18 = vsel %vm418_vm5, %v1416_v29, %v1423_v27 }
 0xaf5   :  { %2066 = vmatprep.subr.msk.mxu0 %vm510_vm7, %v1424_v18 }
 0xaf6   :  { %2067 = vmatpush3.msk.msra.mxu0 %vm510_vm7, %v1424_v18 }
 0xaf7   :  { %2069 = vmatmul.mubr.msk.f32.vlgmr.msra.gmra.mxu0 %vm503_vm6, %v2322_v25  ;;  %2078 = vmatprep.subr.mxu0 %v2145_v39 }
 0xaf8   :  { %2082 = vmatprep.mubr.msk.f32.mxu0 %vm2146_vm3, %v2145_v39 }
 0xbb7   :  { %v2070_v4 = vpop.f32.mrf.mxu0 }
 0xbb8   :  { %v1516_v19 = vadd.f32 1e-05, %v2070_v4  ;;  %1510 = vperm.xlu0 %2109, %v2070_v4  }
 0xbb9   :  { %v1494_v23 = vpop.f32.mrf.mxu0 }
 0xbba   :  { %2133 = vrsqrt.f32 %v1516_v19  ;;  %v1515_v24 = vadd.f32 1e-05, %v1494_v23  ;;  %1505 = vperm.xlu1 %2110, %v1494_v23  }
 0xbbc   :  { %2112 = vset.pattern.permute.xlu0 %v2149_v44  ;;  %2135 = vrsqrt.f32 %v1515_v24 }
 0xbbe   :  { %2111 = vset.pattern.permute.xlu1 %v2149_v44 }
 0xbc7   :  { %v2134_v26 = vpop.eup %2133 }
 0xbc8   :  { %1526 = vperm.xlu1 %2111, %v2134_v26  }
 0xbc9   :  { %v2136_v25 = vpop.eup %2135 }
 0xbcc   :  { %1521 = vperm.xlu1 %2111, %v2136_v25  }
 0xc33   :  { %v1511_v28 = vpop.permute.xlu0 %1510 }
 0xc34   :  { %v1514_v31 = vsub.f32 %v1329_v59, %v1511_v28  ;;  %v49_v59 = vld [vmem:[%s2525_s1 + $0xa8] sm:$0xff] }
 0xc35   :  { %v1506_v30 = vpop.permute.xlu1 %1505 }
 0xc36   :  { %v1513_v35 = vsub.f32 %v2442_v3, %v1506_v30  ;;  %v46_v3 = vld [vmem:[%s2525_s1 + $0x90] sm:$0xff] }
 0xc43   :  { %v1527_v32 = vpop.permute.xlu1 %1526 }
 0xc44   :  { %v1530_v34 = vmul.f32 %v1527_v32, %v1514_v31 }
 0xc46   :  { %v1536_v44 = vmul.f32 %v1534_v48, %v1530_v34 }
 0xc47   :  { %v1522_v36 = vpop.permute.xlu1 %1521 }
 0xc48   :  { %v1542_v37 = vadd.f32 %v1540_v17, %v1536_v44  ;;  %v1529_v53 = vmul.f32 %v1522_v36, %v1513_v35 }
 0xc4a   :  { %v1535_v38 = vmul.f32 %v1534_v48, %v1529_v53  ;;  %2072 = vmatpush3.xpose.msk.msra.mxu1 %vm67_vm0, %v1542_v37  ;;  %2079 = vmatpush3.msra.mxu0 %v1542_v37 }
 0xc4b   :  { %2073 = vmatprep.subr.mxu1 %v2145_v39  ;;  %2080 = vmatprep.subr.mxu0 %v2145_v39 }
 0xc4c   :  { %v1541_v58 = vadd.f32 %v1540_v17, %v1535_v38 }
 0xc4e   :  { %2074 = vmatpush3.xpose.msk.msra.mxu1 %vm67_vm0, %v1541_v58  ;;  %2081 = vmatpush3.msra.mxu0 %v1541_v58 }
 0xc4f   :  { %2085 = vmatprep.subr.mxu0 %v2145_v39 }
 0xc51   :  { %2076 = vmatmul.mubr.msk.f32.vlgmr.msra.gmra.mxu1 %vm67_vm0, %v1543_v41 }
 0xd11   :  { %v1618_v60 = vpop.f32.mrf.mxu1 }
 0xd12   :  { %v1626_v42 = vrot.slane %v1618_v60, %v2234_v21 }
 0xd13   :  { %v2077_v55 = vpop.f32.mrf.mxu1 }
 0xd14   :  { %v1627_v9 = vsel %vm1622_vm12, %v1626_v42, -1e+30 }
 0xd15   :  { %v1628_v43 = vsel %vm52_vm4, %v1627_v9, -inf }
 0xd16   :  { %1629 = vmax.xlane.f32.xlu1 %v1628_v43 }
 0xd9f   :  { %v1630_v45 = vpop.xlane.xlu1 %1629 }
 0xda0   :  { %v1631_v46 = vsub.f32 %v1627_v9, %v1630_v45 }
 0xda2   :  { %v1632_v47 = vmul.f32 1.442695, %v1631_v46 }
 0xda4   :  { %2137 = vpow2.f32 %v1632_v47 }
 0xdb1   :  { %v2138_v49 = vpop.eup %2137 }
 0xdb2   :  { %v1634_v50 = vmul.f32 %v2138_v49, %v2270_v40  ;;  %v47_v40 = vld [vmem:[%s2525_s1 + $0x98] sm:$0xff] }
 0xdb4   :  { %v1635_v51 = vsel %vm52_vm4, %v1634_v50, 0.0 }
 0xdb5   :  { %1636 = vadd.xlane.f32.xlu0 %v1635_v51 }
 0xe3e   :  { %v1637_v52 = vpop.xlane.xlu0 %1636 }
 0xe3f   :  { %v1638_v54 = vmax.f32 %v1637_v52, 1e-30 }
 0xe41   :  { %2139 = vrcp.f32 %v1638_v54 }
 0xe4e   :  { %v2140_v6 = vpop.eup %2139 }
 0xe4f   :  { %v1640_v21 = vmul.f32 %v2140_v6, %v1634_v50 }
 0xe51   :  { %2083 = vmatmul.mubr.msk.f32.vlgmr.msra.gmra.mxu0 %vm153_vm1, %v1640_v21  ;;  %vm1835_vm1 = vcmask 74752  }
 0xe52   :  { %2086 = vmatpush3.msra.mxu0 %v49_v59  ;;  %2093 = vmatprep.mubr.msk.f32.mxu0 %vm2146_vm3, %v2145_v39 }
 0xe53   :  { %2087 = vmatprep.subr.mxu0 %v2145_v39 }
 0xe54   :  { %2088 = vmatpush3.msra.mxu0 %v48_v61 }
 0xe55   :  { %2089 = vmatprep.subr.mxu0 %v2145_v39 }
 0xe56   :  { %2090 = vmatpush3.msra.mxu0 %v47_v40 }
 0xe57   :  { %2091 = vmatprep.subr.mxu0 %v2145_v39 }
 0xe58   :  { %2092 = vmatpush3.msra.mxu0 %v46_v3 }
 0xf11   :  { %v1710_v62 = vpop.f32.mrf.mxu0 }
 0xf12   :  { %2094 = vmatmul.mubr.msk.f32.vlgmr.msra.gmra.mxu0 %vm67_vm0, %v1710_v62  ;;  %vm1832_vm0 = vcmask 72704  }
 0xf13   :  { %v2084_v63 = vpop.f32.mrf.mxu0 }
 0xfd2   :  { %v1787_v22 = vpop.f32.mrf.mxu0 }
 0xfd3   :  { %v1788_v56 = vadd.f32 %v1787_v22, %v1717_v0 }
 0xfd4   :  { %v2095_v57 = vpop.f32.mrf.mxu0 }
 0xfd5   :  { %v1792_v1 = vsel %vm1791_vm13, %v1788_v56, -inf  ;;  %v1804_v29 = vmul.f32 %v1788_v56, %v23_v8 }
 0xfd6   :  { %1793 = vmax.xlane.f32.xlu1 %v1792_v1 }
 0xfd7   :  { %v1805_v20 = vsel %vm1791_vm13, %v1804_v29, 0.0 }
0x105f   :  { %v1794_v2 = vpop.xlane.xlu1 %1793 }
0x1060   :  { %v1795_v5 = vsub.f32 %v1788_v56, %v1794_v2 }
0x1062   :  { %v1796_v7 = vmul.f32 1.442695, %v1795_v5 }
0x1064   :  { %2141 = vpow2.f32 %v1796_v7 }
0x1071   :  { %v2142_v10 = vpop.eup %2141 }
0x1072   :  { %v1798_v11 = vsel %vm1791_vm13, %v2142_v10, 0.0 }
0x1073   :  { %1799 = vadd.xlane.f32.xlu1 %v1798_v11 }
0x1077   :  { %1806 = vadd.xlane.f32.xlu1 %v1805_v20 }
0x10fc   :  { %v1800_v16 = vpop.xlane.xlu1 %1799 }
0x10fd   :  { %2143 = vlog2.f32 %v1800_v16 }
0x1100   :  { %v1807_v33 = vpop.xlane.xlu1 %1806 }
0x1101   :  { %vm1817_vm14 = vcmp.ge.f32.partialorder %v1807_v33, %v1794_v2 }
0x1102   :  { %v1877_v12 = vsel %vm1817_vm14, 1.0, %v2145_v39 }
0x1103   :  { %v1820_v13 = vsel %vm510_vm7, %v1877_v12, 0.0 }
0x1104   :  { %v1821_v14 = vrot.slane %v1820_v13, 4 }
0x1106   :  { %v1822_v18 = vadd.f32 %v1821_v14, %v1820_v13 }
0x1108   :  { %v1823_v23 = vrot.slane %v1822_v18, 2 }
0x110a   :  { %v2144_v15 = vpop.eup %2143  ;;  %v1824_v25 = vadd.f32 %v1823_v23, %v1822_v18 }
0x110b   :  { %v1802_v27 = vmul.f32 0.6931472, %v2144_v15 }
0x110c   :  { %v1825_v31 = vrot.slane %v1824_v25, 1 }
0x110d   :  { %v1803_v4 = vadd.f32 %v1802_v27, %v1794_v2 }
0x110e   :  { %v1826_v17 = vadd.f32 %v1825_v31, %v1824_v25 }
0x110f   :  { %v1808_v19 = vsub.f32 %v1803_v4, %v1807_v33 }
0x1110   :  { %v1827_v35 = vmul.f32 0.5, %v1826_v17 }
0x1111   :  { %v1809_v24 = vsel %vm510_vm7, %v1808_v19, 0.0 }
0x1112   :  { %v1810_v26 = vrot.slane %v1809_v24, 4 }
0x1114   :  { %v1811_v28 = vadd.f32 %v1810_v26, %v1809_v24 }
0x1116   :  { %v1812_v30 = vrot.slane %v1811_v28, 2 }
0x1118   :  { %v1813_v48 = vadd.f32 %v1812_v30, %v1811_v28 }
0x111a   :  { %v1814_v32 = vrot.slane %v1813_v48, 1 }
0x111c   :  { %v1815_v39 = vadd.f32 %v1814_v32, %v1813_v48 }
0x111e   :  { %v1816_v34 = vmul.f32 0.5, %v1815_v39 }
0x1120   :  { %v1831_v44 = vsel %vm1830_vm15, %v1788_v56, %v1816_v34 }
0x1121   :  { %v1833_v36 = vsel %vm1832_vm0, %v1831_v44, %v1827_v35 }
0x1122   :  { %1836 = vst.msk [vmem:[%s2527_s2] sm:$0x3] %vm1835_vm1, %v1833_v36 }

</bundles_post_ra>
